<compile_context>
chip_gen: v6e
topology: v6e:2x2x1
jax: 0.10.0
libtpu: 0.0.40
codegen_flags: <defaults>
</compile_context>

<pallas_src>
import functools

import jax
import jax.numpy as jnp
from jax.experimental import pallas as pl
from jax.experimental.pallas import tpu as pltpu

C = 32          # channels, fixed by the module
K = 3           # conv kernel size
N_BLOCKS = 2    # n_residual_blocks
EPS = 1e-5      # BatchNorm eps
DIL0 = 2        # dilation == padding of the first conv in each block
DIL12 = 1       # dilation == padding of the second/third convs


def _agg_res_kernel(x_ref, w0_ref, b0_ref, w_ref, b_ref, o_ref, *, L, b_tile):
    """x_ref/o_ref: (b_tile, C, L) f32; w0_ref: (2C, 3C) bf16; b0_ref: (2C, 1) f32;
    w_ref: (N_BLOCKS, 2, C, 3C) bf16; b_ref: (N_BLOCKS, 2, C, 1) f32."""
    lane = jax.lax.broadcasted_iota(jnp.int32, (C, L), 1)
    # Boundary masks for the +/-d shifted taps (hoisted out of all loops).
    masks = {d: (lane >= d, lane < L - d) for d in (DIL0, DIL12)}

    def packed_taps(h, d):
        """h: (C, L) f32 -> (3C, L) bf16 slab [h(l-d); h(l); h(l+d)], zero-padded."""
        keep_lo, keep_hi = masks[d]
        left = jnp.where(keep_lo, pltpu.roll(h, d, axis=1), 0.0)       # h[l - d]
        right = jnp.where(keep_hi, pltpu.roll(h, L - d, axis=1), 0.0)  # h[l + d]
        return jnp.concatenate([left, h, right], axis=0).astype(jnp.bfloat16)

    for b in range(b_tile):
        x = x_ref[b]                                                   # (C, L) f32
        # conv0 of BOTH residual blocks fused into one (2C, 3C) @ (3C, L) matmul.
        y0 = jnp.dot(w0_ref[...], packed_taps(x, DIL0),
                     preferred_element_type=jnp.float32)               # (2C, L)
        y0 = jnp.maximum(y0 + b0_ref[...], 0.0)                        # bias(+BN) + ReLU
        agg = 5.0 * x                                                  # sum(out) + x
        for bi in range(N_BLOCKS):
            h = y0[bi * C:(bi + 1) * C]
            for ci in range(2):                                        # conv1, conv2
                y = jnp.dot(w_ref[bi, ci], packed_taps(h, DIL12),
                            preferred_element_type=jnp.float32)        # (C, L)
                h = jnp.maximum(y + b_ref[bi, ci], 0.0)
            agg = agg + h
        o_ref[b] = agg


def _pick_batch_tile(n):
    """Largest small batch tile that still leaves >= 2 grid steps (v7x 2 TCs)."""
    for bt in (8, 4, 2):
        if n % bt == 0 and n // bt >= 2:
            return bt
    return 1


def aggregated_residual_blocks_fwd(x_ncl, params):
    """x_ncl: (N, 32, L) float32 (PyTorch NCL). Returns (N, 32, L) float32."""
    wc0, bc0, w_rest, b_rest = params
    N, Cc, L = x_ncl.shape
    assert Cc == C
    b_tile = _pick_batch_tile(N)
    kernel = functools.partial(_agg_res_kernel, L=L, b_tile=b_tile)

    cp = dict(dimension_semantics=("parallel",))
    # in + out tiles are double-buffered; guard scoped VMEM for long L
    # (v5e default scoped VMEM is 16 MiB, v7x physical VMEM is 64 MiB).
    vmem_est = 4 * (b_tile * C * L * 4) + (2 << 20)
    if vmem_est > (16 << 20):
        cp["vmem_limit_bytes"] = int(min(2 * vmem_est, 64 << 20))

    return pl.pallas_call(
        kernel,
        out_shape=jax.ShapeDtypeStruct((N, C, L), jnp.float32),
        grid_spec=pltpu.PrefetchScalarGridSpec(
            num_scalar_prefetch=0,
            grid=(N // b_tile,),
            in_specs=[
                pl.BlockSpec((b_tile, C, L), lambda n: (n, 0, 0)),
                pl.BlockSpec((2 * C, K * C), lambda n: (0, 0)),
                pl.BlockSpec((2 * C, 1), lambda n: (0, 0)),
                pl.BlockSpec((N_BLOCKS, 2, C, K * C), lambda n: (0, 0, 0, 0)),
                pl.BlockSpec((N_BLOCKS, 2, C, 1), lambda n: (0, 0, 0, 0)),
            ],
            out_specs=pl.BlockSpec((b_tile, C, L), lambda n: (n, 0, 0)),
        ),
        compiler_params=pltpu.CompilerParams(**cp),
    )(x_ncl.astype(jnp.float32), wc0, bc0, w_rest, b_rest)


def init_params(key):
    """Deterministic init; eval-mode BN folded into tap-packed conv weights.

    Returns:
      wc0:    (64, 96)        bf16  fused conv0 weights of block0+block1
      bc0:    (64, 1)         f32   fused conv0 biases
      w_rest: (2, 2, 32, 96)  bf16  [block][conv1/conv2] tap-packed weights
      b_rest: (2, 2, 32, 1)   f32   matching biases
    Packed layout: column index = k * C + c_in  (k = tap 0/1/2).
    """
    w_packed, b_packed = [], []
    for _bi in range(N_BLOCKS):
        wrow, brow = [], []
        for _ci in range(3):
            key, k1, k2, k3, k4, k5, k6 = jax.random.split(key, 7)
            bound = 1.0 / jnp.sqrt(jnp.float32(C * K))
            w = jax.random.uniform(k1, (C, C, K), jnp.float32, -bound, bound)  # (Cout,Cin,K)
            b = jax.random.uniform(k2, (C,), jnp.float32, -bound, bound)
            gamma = 1.0 + 0.1 * jax.random.normal(k3, (C,), jnp.float32)
            beta = 0.1 * jax.random.normal(k4, (C,), jnp.float32)
            mean = 0.1 * jax.random.normal(k5, (C,), jnp.float32)
            var = jnp.abs(jax.random.normal(k6, (C,), jnp.float32)) + 0.5
            scale = gamma / jnp.sqrt(var + EPS)
            wp = jnp.transpose(w, (0, 2, 1)).reshape(C, K * C) * scale[:, None]
            bp = (b - mean) * scale + beta
            wrow.append(wp)
            brow.append(bp)
        w_packed.append(wrow)
        b_packed.append(brow)

    wc0 = jnp.concatenate([w_packed[0][0], w_packed[1][0]], axis=0).astype(jnp.bfloat16)
    bc0 = jnp.concatenate([b_packed[0][0], b_packed[1][0]], axis=0).reshape(2 * C, 1)
    w_rest = jnp.stack(
        [jnp.stack([w_packed[bi][ci] for ci in (1, 2)], axis=0) for bi in range(N_BLOCKS)],
        axis=0).astype(jnp.bfloat16)
    b_rest = jnp.stack(
        [jnp.stack([b_packed[bi][ci] for ci in (1, 2)], axis=0) for bi in range(N_BLOCKS)],
        axis=0).reshape(N_BLOCKS, 2, C, 1)
    return wc0, bc0, w_rest, b_rest


def ref_forward(x_ncl, wc0, bc0, w_rest, b_rest):
    """Pure-JAX reference with identical math/precision (for self-check)."""
    x = x_ncl.astype(jnp.float32)                   # (N, C, L)
    L = x.shape[-1]

    def pack(h, d):
        left = jnp.pad(h, ((0, 0), (0, 0), (d, 0)))[:, :, :L]   # h[l-d]
        right = jnp.pad(h, ((0, 0), (0, 0), (0, d)))[:, :, d:]  # h[l+d]
        return jnp.concatenate([left, h, right], axis=1).astype(jnp.bfloat16)

    y0 = jnp.einsum("oc,ncl->nol", wc0, pack(x, DIL0),
                    preferred_element_type=jnp.float32)
    y0 = jnp.maximum(y0 + bc0[None], 0.0)
    agg = 5.0 * x
    for bi in range(N_BLOCKS):
        h = y0[:, bi * C:(bi + 1) * C]
        for ci in range(2):
            y = jnp.einsum("oc,ncl->nol", w_rest[bi, ci], pack(h, DIL12),
                           preferred_element_type=jnp.float32)
            h = jnp.maximum(y + b_rest[bi, ci][None], 0.0)
        agg = agg + h
    return agg


if __name__ == "__main__":
    key = jax.random.PRNGKey(0)
    key, kx, kp = jax.random.split(key, 3)
    N, L = 4, 128
    x = jax.random.normal(kx, (N, C, L), jnp.float32)   # PyTorch NCL input
    params = init_params(kp)

    out = jax.block_until_ready(aggregated_residual_blocks_fwd(x, params))
    ref = ref_forward(x, *params)

    assert out.shape == x.shape, (out.shape, x.shape)
    max_err = float(jnp.max(jnp.abs(out - ref)))
    assert jnp.allclose(out, ref, atol=5e-3, rtol=5e-3), max_err
    print("KERNEL_OK")
</pallas_src>

<mosaic_0001>
module attributes {stable_mosaic.version = 11 : i64} {
  func.func @_agg_res_kernel(%arg0: i32, %arg1: memref<2x32x128xf32, #tpu.memory_space<vmem>>, %arg2: memref<64x96xbf16, #tpu.memory_space<vmem>>, %arg3: memref<64x1xf32, #tpu.memory_space<vmem>>, %arg4: memref<2x2x32x96xbf16, #tpu.memory_space<vmem>>, %arg5: memref<2x2x32x1xf32, #tpu.memory_space<vmem>>, %arg6: memref<2x32x128xf32, #tpu.memory_space<vmem>>) attributes {dimension_semantics = [#tpu.dimension_semantics<parallel>], iteration_bounds = array<i64: 2>, scalar_prefetch = 0 : i64, scratch_operands = 0 : i64, tpu.core_type = #tpu.core_type<tc>, window_params = [{transform_indices = @transform_0, window_bounds = array<i64: 2, 32, 128>}, {pipeline_mode = #tpu.pipeline_mode<synchronous>, transform_indices = @transform_1, window_bounds = array<i64: 64, 96>}, {pipeline_mode = #tpu.pipeline_mode<synchronous>, transform_indices = @transform_2, window_bounds = array<i64: 64, 1>}, {pipeline_mode = #tpu.pipeline_mode<synchronous>, transform_indices = @transform_3, window_bounds = array<i64: 2, 2, 32, 96>}, {pipeline_mode = #tpu.pipeline_mode<synchronous>, transform_indices = @transform_4, window_bounds = array<i64: 2, 2, 32, 1>}, {transform_indices = @transform_5, window_bounds = array<i64: 2, 32, 128>}]} {
    %0 = tpu.iota {dimensions = array<i32: 1>} : vector<32x128xi32>
    %c2_i32 = arith.constant 2 : i32
    %1 = vector.broadcast %c2_i32 : i32 to vector<32x128xi32>
    %2 = arith.cmpi sge, %0, %1 : vector<32x128xi32>
    %c126_i32 = arith.constant 126 : i32
    %3 = vector.broadcast %c126_i32 : i32 to vector<32x128xi32>
    %4 = arith.cmpi slt, %0, %3 : vector<32x128xi32>
    %c1_i32 = arith.constant 1 : i32
    %5 = vector.broadcast %c1_i32 : i32 to vector<32x128xi32>
    %6 = arith.cmpi sge, %0, %5 : vector<32x128xi32>
    %c127_i32 = arith.constant 127 : i32
    %7 = vector.broadcast %c127_i32 : i32 to vector<32x128xi32>
    %8 = arith.cmpi slt, %0, %7 : vector<32x128xi32>
    %c0 = arith.constant 0 : index
    %c0_0 = arith.constant 0 : index
    %c0_1 = arith.constant 0 : index
    %9 = vector.load %arg1[%c0, %c0_0, %c0_1] : memref<2x32x128xf32, #tpu.memory_space<vmem>>, vector<1x32x128xf32>
    %10 = vector.shape_cast %9 : vector<1x32x128xf32> to vector<32x128xf32>
    %c0_2 = arith.constant 0 : index
    %c0_3 = arith.constant 0 : index
    %11 = vector.load %arg2[%c0_2, %c0_3] : memref<64x96xbf16, #tpu.memory_space<vmem>>, vector<64x96xbf16>
    %c2_i32_4 = arith.constant 2 : i32
    %12 = tpu.dynamic_rotate %10 by %c2_i32_4 dim 1 : vector<32x128xf32>, i32 -> vector<32x128xf32>
    %cst = arith.constant 0.000000e+00 : f32
    %13 = vector.broadcast %cst : f32 to vector<32x128xf32>
    %14 = arith.select %2, %12, %13 : vector<32x128xi1>, vector<32x128xf32>
    %c126_i32_5 = arith.constant 126 : i32
    %15 = tpu.dynamic_rotate %10 by %c126_i32_5 dim 1 : vector<32x128xf32>, i32 -> vector<32x128xf32>
    %cst_6 = arith.constant 0.000000e+00 : f32
    %16 = vector.broadcast %cst_6 : f32 to vector<32x128xf32>
    %17 = arith.select %4, %15, %16 : vector<32x128xi1>, vector<32x128xf32>
    %18 = tpu.concatenate %14, %10, %17 in 0 : vector<32x128xf32>, vector<32x128xf32>, vector<32x128xf32> -> vector<96x128xf32>
    %19 = arith.truncf %18 : vector<96x128xf32> to vector<96x128xbf16>
    %cst_7 = arith.constant dense<0.000000e+00> : vector<64x128xf32>
    %20 = tpu.matmul %11, %19, %cst_7 {dimension_numbers = #tpu.dot_dimension_numbers<[1], [0], [0], [1], [0, 0, 1, 1], [], []>} : vector<64x96xbf16>, vector<96x128xbf16>, vector<64x128xf32> -> vector<64x128xf32>
    %c0_8 = arith.constant 0 : index
    %c0_9 = arith.constant 0 : index
    %21 = vector.load %arg3[%c0_8, %c0_9] : memref<64x1xf32, #tpu.memory_space<vmem>>, vector<64x1xf32>
    %22 = vector.broadcast %21 : vector<64x1xf32> to vector<64x128xf32>
    %23 = arith.addf %20, %22 : vector<64x128xf32>
    %cst_10 = arith.constant 0.000000e+00 : f32
    %24 = vector.broadcast %cst_10 : f32 to vector<64x128xf32>
    %25 = arith.maximumf %23, %24 : vector<64x128xf32>
    %cst_11 = arith.constant 5.000000e+00 : f32
    %26 = vector.broadcast %cst_11 : f32 to vector<32x128xf32>
    %27 = arith.mulf %26, %10 : vector<32x128xf32>
    %28 = vector.extract_strided_slice %25 {offsets = [0, 0], sizes = [32, 128], strides = [1, 1]} : vector<64x128xf32> to vector<32x128xf32>
    %c0_12 = arith.constant 0 : index
    %c0_13 = arith.constant 0 : index
    %c0_14 = arith.constant 0 : index
    %c0_15 = arith.constant 0 : index
    %29 = vector.load %arg4[%c0_12, %c0_13, %c0_14, %c0_15] : memref<2x2x32x96xbf16, #tpu.memory_space<vmem>>, vector<1x1x32x96xbf16>
    %30 = vector.shape_cast %29 : vector<1x1x32x96xbf16> to vector<32x96xbf16>
    %c1_i32_16 = arith.constant 1 : i32
    %31 = tpu.dynamic_rotate %28 by %c1_i32_16 dim 1 : vector<32x128xf32>, i32 -> vector<32x128xf32>
    %cst_17 = arith.constant 0.000000e+00 : f32
    %32 = vector.broadcast %cst_17 : f32 to vector<32x128xf32>
    %33 = arith.select %6, %31, %32 : vector<32x128xi1>, vector<32x128xf32>
    %c127_i32_18 = arith.constant 127 : i32
    %34 = tpu.dynamic_rotate %28 by %c127_i32_18 dim 1 : vector<32x128xf32>, i32 -> vector<32x128xf32>
    %cst_19 = arith.constant 0.000000e+00 : f32
    %35 = vector.broadcast %cst_19 : f32 to vector<32x128xf32>
    %36 = arith.select %8, %34, %35 : vector<32x128xi1>, vector<32x128xf32>
    %37 = tpu.concatenate %33, %28, %36 in 0 : vector<32x128xf32>, vector<32x128xf32>, vector<32x128xf32> -> vector<96x128xf32>
    %38 = arith.truncf %37 : vector<96x128xf32> to vector<96x128xbf16>
    %cst_20 = arith.constant dense<0.000000e+00> : vector<32x128xf32>
    %39 = tpu.matmul %30, %38, %cst_20 {dimension_numbers = #tpu.dot_dimension_numbers<[1], [0], [0], [1], [0, 0, 1, 1], [], []>} : vector<32x96xbf16>, vector<96x128xbf16>, vector<32x128xf32> -> vector<32x128xf32>
    %c0_21 = arith.constant 0 : index
    %c0_22 = arith.constant 0 : index
    %c0_23 = arith.constant 0 : index
    %c0_24 = arith.constant 0 : index
    %40 = vector.load %arg5[%c0_21, %c0_22, %c0_23, %c0_24] : memref<2x2x32x1xf32, #tpu.memory_space<vmem>>, vector<1x1x32x1xf32>
    %41 = vector.shape_cast %40 : vector<1x1x32x1xf32> to vector<32x1xf32>
    %42 = vector.broadcast %41 : vector<32x1xf32> to vector<32x128xf32>
    %43 = arith.addf %39, %42 : vector<32x128xf32>
    %cst_25 = arith.constant 0.000000e+00 : f32
    %44 = vector.broadcast %cst_25 : f32 to vector<32x128xf32>
    %45 = arith.maximumf %43, %44 : vector<32x128xf32>
    %c0_26 = arith.constant 0 : index
    %c1 = arith.constant 1 : index
    %c0_27 = arith.constant 0 : index
    %c0_28 = arith.constant 0 : index
    %46 = vector.load %arg4[%c0_26, %c1, %c0_27, %c0_28] : memref<2x2x32x96xbf16, #tpu.memory_space<vmem>>, vector<1x1x32x96xbf16>
    %47 = vector.shape_cast %46 : vector<1x1x32x96xbf16> to vector<32x96xbf16>
    %c1_i32_29 = arith.constant 1 : i32
    %48 = tpu.dynamic_rotate %45 by %c1_i32_29 dim 1 : vector<32x128xf32>, i32 -> vector<32x128xf32>
    %cst_30 = arith.constant 0.000000e+00 : f32
    %49 = vector.broadcast %cst_30 : f32 to vector<32x128xf32>
    %50 = arith.select %6, %48, %49 : vector<32x128xi1>, vector<32x128xf32>
    %c127_i32_31 = arith.constant 127 : i32
    %51 = tpu.dynamic_rotate %45 by %c127_i32_31 dim 1 : vector<32x128xf32>, i32 -> vector<32x128xf32>
    %cst_32 = arith.constant 0.000000e+00 : f32
    %52 = vector.broadcast %cst_32 : f32 to vector<32x128xf32>
    %53 = arith.select %8, %51, %52 : vector<32x128xi1>, vector<32x128xf32>
    %54 = tpu.concatenate %50, %45, %53 in 0 : vector<32x128xf32>, vector<32x128xf32>, vector<32x128xf32> -> vector<96x128xf32>
    %55 = arith.truncf %54 : vector<96x128xf32> to vector<96x128xbf16>
    %cst_33 = arith.constant dense<0.000000e+00> : vector<32x128xf32>
    %56 = tpu.matmul %47, %55, %cst_33 {dimension_numbers = #tpu.dot_dimension_numbers<[1], [0], [0], [1], [0, 0, 1, 1], [], []>} : vector<32x96xbf16>, vector<96x128xbf16>, vector<32x128xf32> -> vector<32x128xf32>
    %c0_34 = arith.constant 0 : index
    %c1_35 = arith.constant 1 : index
    %c0_36 = arith.constant 0 : index
    %c0_37 = arith.constant 0 : index
    %57 = vector.load %arg5[%c0_34, %c1_35, %c0_36, %c0_37] : memref<2x2x32x1xf32, #tpu.memory_space<vmem>>, vector<1x1x32x1xf32>
    %58 = vector.shape_cast %57 : vector<1x1x32x1xf32> to vector<32x1xf32>
    %59 = vector.broadcast %58 : vector<32x1xf32> to vector<32x128xf32>
    %60 = arith.addf %56, %59 : vector<32x128xf32>
    %cst_38 = arith.constant 0.000000e+00 : f32
    %61 = vector.broadcast %cst_38 : f32 to vector<32x128xf32>
    %62 = arith.maximumf %60, %61 : vector<32x128xf32>
    %63 = arith.addf %27, %62 : vector<32x128xf32>
    %64 = vector.extract_strided_slice %25 {offsets = [32, 0], sizes = [32, 128], strides = [1, 1]} : vector<64x128xf32> to vector<32x128xf32>
    %c1_39 = arith.constant 1 : index
    %c0_40 = arith.constant 0 : index
    %c0_41 = arith.constant 0 : index
    %c0_42 = arith.constant 0 : index
    %65 = vector.load %arg4[%c1_39, %c0_40, %c0_41, %c0_42] : memref<2x2x32x96xbf16, #tpu.memory_space<vmem>>, vector<1x1x32x96xbf16>
    %66 = vector.shape_cast %65 : vector<1x1x32x96xbf16> to vector<32x96xbf16>
    %c1_i32_43 = arith.constant 1 : i32
    %67 = tpu.dynamic_rotate %64 by %c1_i32_43 dim 1 : vector<32x128xf32>, i32 -> vector<32x128xf32>
    %cst_44 = arith.constant 0.000000e+00 : f32
    %68 = vector.broadcast %cst_44 : f32 to vector<32x128xf32>
    %69 = arith.select %6, %67, %68 : vector<32x128xi1>, vector<32x128xf32>
    %c127_i32_45 = arith.constant 127 : i32
    %70 = tpu.dynamic_rotate %64 by %c127_i32_45 dim 1 : vector<32x128xf32>, i32 -> vector<32x128xf32>
    %cst_46 = arith.constant 0.000000e+00 : f32
    %71 = vector.broadcast %cst_46 : f32 to vector<32x128xf32>
    %72 = arith.select %8, %70, %71 : vector<32x128xi1>, vector<32x128xf32>
    %73 = tpu.concatenate %69, %64, %72 in 0 : vector<32x128xf32>, vector<32x128xf32>, vector<32x128xf32> -> vector<96x128xf32>
    %74 = arith.truncf %73 : vector<96x128xf32> to vector<96x128xbf16>
    %cst_47 = arith.constant dense<0.000000e+00> : vector<32x128xf32>
    %75 = tpu.matmul %66, %74, %cst_47 {dimension_numbers = #tpu.dot_dimension_numbers<[1], [0], [0], [1], [0, 0, 1, 1], [], []>} : vector<32x96xbf16>, vector<96x128xbf16>, vector<32x128xf32> -> vector<32x128xf32>
    %c1_48 = arith.constant 1 : index
    %c0_49 = arith.constant 0 : index
    %c0_50 = arith.constant 0 : index
    %c0_51 = arith.constant 0 : index
    %76 = vector.load %arg5[%c1_48, %c0_49, %c0_50, %c0_51] : memref<2x2x32x1xf32, #tpu.memory_space<vmem>>, vector<1x1x32x1xf32>
    %77 = vector.shape_cast %76 : vector<1x1x32x1xf32> to vector<32x1xf32>
    %78 = vector.broadcast %77 : vector<32x1xf32> to vector<32x128xf32>
    %79 = arith.addf %75, %78 : vector<32x128xf32>
    %cst_52 = arith.constant 0.000000e+00 : f32
    %80 = vector.broadcast %cst_52 : f32 to vector<32x128xf32>
    %81 = arith.maximumf %79, %80 : vector<32x128xf32>
    %c1_53 = arith.constant 1 : index
    %c1_54 = arith.constant 1 : index
    %c0_55 = arith.constant 0 : index
    %c0_56 = arith.constant 0 : index
    %82 = vector.load %arg4[%c1_53, %c1_54, %c0_55, %c0_56] : memref<2x2x32x96xbf16, #tpu.memory_space<vmem>>, vector<1x1x32x96xbf16>
    %83 = vector.shape_cast %82 : vector<1x1x32x96xbf16> to vector<32x96xbf16>
    %c1_i32_57 = arith.constant 1 : i32
    %84 = tpu.dynamic_rotate %81 by %c1_i32_57 dim 1 : vector<32x128xf32>, i32 -> vector<32x128xf32>
    %cst_58 = arith.constant 0.000000e+00 : f32
    %85 = vector.broadcast %cst_58 : f32 to vector<32x128xf32>
    %86 = arith.select %6, %84, %85 : vector<32x128xi1>, vector<32x128xf32>
    %c127_i32_59 = arith.constant 127 : i32
    %87 = tpu.dynamic_rotate %81 by %c127_i32_59 dim 1 : vector<32x128xf32>, i32 -> vector<32x128xf32>
    %cst_60 = arith.constant 0.000000e+00 : f32
    %88 = vector.broadcast %cst_60 : f32 to vector<32x128xf32>
    %89 = arith.select %8, %87, %88 : vector<32x128xi1>, vector<32x128xf32>
    %90 = tpu.concatenate %86, %81, %89 in 0 : vector<32x128xf32>, vector<32x128xf32>, vector<32x128xf32> -> vector<96x128xf32>
    %91 = arith.truncf %90 : vector<96x128xf32> to vector<96x128xbf16>
    %cst_61 = arith.constant dense<0.000000e+00> : vector<32x128xf32>
    %92 = tpu.matmul %83, %91, %cst_61 {dimension_numbers = #tpu.dot_dimension_numbers<[1], [0], [0], [1], [0, 0, 1, 1], [], []>} : vector<32x96xbf16>, vector<96x128xbf16>, vector<32x128xf32> -> vector<32x128xf32>
    %c1_62 = arith.constant 1 : index
    %c1_63 = arith.constant 1 : index
    %c0_64 = arith.constant 0 : index
    %c0_65 = arith.constant 0 : index
    %93 = vector.load %arg5[%c1_62, %c1_63, %c0_64, %c0_65] : memref<2x2x32x1xf32, #tpu.memory_space<vmem>>, vector<1x1x32x1xf32>
    %94 = vector.shape_cast %93 : vector<1x1x32x1xf32> to vector<32x1xf32>
    %95 = vector.broadcast %94 : vector<32x1xf32> to vector<32x128xf32>
    %96 = arith.addf %92, %95 : vector<32x128xf32>
    %cst_66 = arith.constant 0.000000e+00 : f32
    %97 = vector.broadcast %cst_66 : f32 to vector<32x128xf32>
    %98 = arith.maximumf %96, %97 : vector<32x128xf32>
    %99 = arith.addf %63, %98 : vector<32x128xf32>
    %c0_67 = arith.constant 0 : index
    %c0_68 = arith.constant 0 : index
    %c0_69 = arith.constant 0 : index
    %100 = vector.load %arg6[%c0_67, %c0_68, %c0_69] : memref<2x32x128xf32, #tpu.memory_space<vmem>>, vector<1x32x128xf32>
    %101 = vector.shape_cast %100 : vector<1x32x128xf32> to vector<32x128xf32>
    %102 = vector.shape_cast %99 : vector<32x128xf32> to vector<1x32x128xf32>
    tpu.vector_store %arg6[%c0_67, %c0_68, %c0_69], %102 {strides = array<i32>} : memref<2x32x128xf32, #tpu.memory_space<vmem>>, vector<1x32x128xf32>,
    %c1_70 = arith.constant 1 : index
    %c0_71 = arith.constant 0 : index
    %c0_72 = arith.constant 0 : index
    %103 = vector.load %arg1[%c1_70, %c0_71, %c0_72] : memref<2x32x128xf32, #tpu.memory_space<vmem>>, vector<1x32x128xf32>
    %104 = vector.shape_cast %103 : vector<1x32x128xf32> to vector<32x128xf32>
    %c0_73 = arith.constant 0 : index
    %c0_74 = arith.constant 0 : index
    %105 = vector.load %arg2[%c0_73, %c0_74] : memref<64x96xbf16, #tpu.memory_space<vmem>>, vector<64x96xbf16>
    %c2_i32_75 = arith.constant 2 : i32
    %106 = tpu.dynamic_rotate %104 by %c2_i32_75 dim 1 : vector<32x128xf32>, i32 -> vector<32x128xf32>
    %cst_76 = arith.constant 0.000000e+00 : f32
    %107 = vector.broadcast %cst_76 : f32 to vector<32x128xf32>
    %108 = arith.select %2, %106, %107 : vector<32x128xi1>, vector<32x128xf32>
    %c126_i32_77 = arith.constant 126 : i32
    %109 = tpu.dynamic_rotate %104 by %c126_i32_77 dim 1 : vector<32x128xf32>, i32 -> vector<32x128xf32>
    %cst_78 = arith.constant 0.000000e+00 : f32
    %110 = vector.broadcast %cst_78 : f32 to vector<32x128xf32>
    %111 = arith.select %4, %109, %110 : vector<32x128xi1>, vector<32x128xf32>
    %112 = tpu.concatenate %108, %104, %111 in 0 : vector<32x128xf32>, vector<32x128xf32>, vector<32x128xf32> -> vector<96x128xf32>
    %113 = arith.truncf %112 : vector<96x128xf32> to vector<96x128xbf16>
    %cst_79 = arith.constant dense<0.000000e+00> : vector<64x128xf32>
    %114 = tpu.matmul %105, %113, %cst_79 {dimension_numbers = #tpu.dot_dimension_numbers<[1], [0], [0], [1], [0, 0, 1, 1], [], []>} : vector<64x96xbf16>, vector<96x128xbf16>, vector<64x128xf32> -> vector<64x128xf32>
    %c0_80 = arith.constant 0 : index
    %c0_81 = arith.constant 0 : index
    %115 = vector.load %arg3[%c0_80, %c0_81] : memref<64x1xf32, #tpu.memory_space<vmem>>, vector<64x1xf32>
    %116 = vector.broadcast %115 : vector<64x1xf32> to vector<64x128xf32>
    %117 = arith.addf %114, %116 : vector<64x128xf32>
    %cst_82 = arith.constant 0.000000e+00 : f32
    %118 = vector.broadcast %cst_82 : f32 to vector<64x128xf32>
    %119 = arith.maximumf %117, %118 : vector<64x128xf32>
    %cst_83 = arith.constant 5.000000e+00 : f32
    %120 = vector.broadcast %cst_83 : f32 to vector<32x128xf32>
    %121 = arith.mulf %120, %104 : vector<32x128xf32>
    %122 = vector.extract_strided_slice %119 {offsets = [0, 0], sizes = [32, 128], strides = [1, 1]} : vector<64x128xf32> to vector<32x128xf32>
    %c0_84 = arith.constant 0 : index
    %c0_85 = arith.constant 0 : index
    %c0_86 = arith.constant 0 : index
    %c0_87 = arith.constant 0 : index
    %123 = vector.load %arg4[%c0_84, %c0_85, %c0_86, %c0_87] : memref<2x2x32x96xbf16, #tpu.memory_space<vmem>>, vector<1x1x32x96xbf16>
    %124 = vector.shape_cast %123 : vector<1x1x32x96xbf16> to vector<32x96xbf16>
    %c1_i32_88 = arith.constant 1 : i32
    %125 = tpu.dynamic_rotate %122 by %c1_i32_88 dim 1 : vector<32x128xf32>, i32 -> vector<32x128xf32>
    %cst_89 = arith.constant 0.000000e+00 : f32
    %126 = vector.broadcast %cst_89 : f32 to vector<32x128xf32>
    %127 = arith.select %6, %125, %126 : vector<32x128xi1>, vector<32x128xf32>
    %c127_i32_90 = arith.constant 127 : i32
    %128 = tpu.dynamic_rotate %122 by %c127_i32_90 dim 1 : vector<32x128xf32>, i32 -> vector<32x128xf32>
    %cst_91 = arith.constant 0.000000e+00 : f32
    %129 = vector.broadcast %cst_91 : f32 to vector<32x128xf32>
    %130 = arith.select %8, %128, %129 : vector<32x128xi1>, vector<32x128xf32>
    %131 = tpu.concatenate %127, %122, %130 in 0 : vector<32x128xf32>, vector<32x128xf32>, vector<32x128xf32> -> vector<96x128xf32>
    %132 = arith.truncf %131 : vector<96x128xf32> to vector<96x128xbf16>
    %cst_92 = arith.constant dense<0.000000e+00> : vector<32x128xf32>
    %133 = tpu.matmul %124, %132, %cst_92 {dimension_numbers = #tpu.dot_dimension_numbers<[1], [0], [0], [1], [0, 0, 1, 1], [], []>} : vector<32x96xbf16>, vector<96x128xbf16>, vector<32x128xf32> -> vector<32x128xf32>
    %c0_93 = arith.constant 0 : index
    %c0_94 = arith.constant 0 : index
    %c0_95 = arith.constant 0 : index
    %c0_96 = arith.constant 0 : index
    %134 = vector.load %arg5[%c0_93, %c0_94, %c0_95, %c0_96] : memref<2x2x32x1xf32, #tpu.memory_space<vmem>>, vector<1x1x32x1xf32>
    %135 = vector.shape_cast %134 : vector<1x1x32x1xf32> to vector<32x1xf32>
    %136 = vector.broadcast %135 : vector<32x1xf32> to vector<32x128xf32>
    %137 = arith.addf %133, %136 : vector<32x128xf32>
    %cst_97 = arith.constant 0.000000e+00 : f32
    %138 = vector.broadcast %cst_97 : f32 to vector<32x128xf32>
    %139 = arith.maximumf %137, %138 : vector<32x128xf32>
    %c0_98 = arith.constant 0 : index
    %c1_99 = arith.constant 1 : index
    %c0_100 = arith.constant 0 : index
    %c0_101 = arith.constant 0 : index
    %140 = vector.load %arg4[%c0_98, %c1_99, %c0_100, %c0_101] : memref<2x2x32x96xbf16, #tpu.memory_space<vmem>>, vector<1x1x32x96xbf16>
    %141 = vector.shape_cast %140 : vector<1x1x32x96xbf16> to vector<32x96xbf16>
    %c1_i32_102 = arith.constant 1 : i32
    %142 = tpu.dynamic_rotate %139 by %c1_i32_102 dim 1 : vector<32x128xf32>, i32 -> vector<32x128xf32>
    %cst_103 = arith.constant 0.000000e+00 : f32
    %143 = vector.broadcast %cst_103 : f32 to vector<32x128xf32>
    %144 = arith.select %6, %142, %143 : vector<32x128xi1>, vector<32x128xf32>
    %c127_i32_104 = arith.constant 127 : i32
    %145 = tpu.dynamic_rotate %139 by %c127_i32_104 dim 1 : vector<32x128xf32>, i32 -> vector<32x128xf32>
    %cst_105 = arith.constant 0.000000e+00 : f32
    %146 = vector.broadcast %cst_105 : f32 to vector<32x128xf32>
    %147 = arith.select %8, %145, %146 : vector<32x128xi1>, vector<32x128xf32>
    %148 = tpu.concatenate %144, %139, %147 in 0 : vector<32x128xf32>, vector<32x128xf32>, vector<32x128xf32> -> vector<96x128xf32>
    %149 = arith.truncf %148 : vector<96x128xf32> to vector<96x128xbf16>
    %cst_106 = arith.constant dense<0.000000e+00> : vector<32x128xf32>
    %150 = tpu.matmul %141, %149, %cst_106 {dimension_numbers = #tpu.dot_dimension_numbers<[1], [0], [0], [1], [0, 0, 1, 1], [], []>} : vector<32x96xbf16>, vector<96x128xbf16>, vector<32x128xf32> -> vector<32x128xf32>
    %c0_107 = arith.constant 0 : index
    %c1_108 = arith.constant 1 : index
    %c0_109 = arith.constant 0 : index
    %c0_110 = arith.constant 0 : index
    %151 = vector.load %arg5[%c0_107, %c1_108, %c0_109, %c0_110] : memref<2x2x32x1xf32, #tpu.memory_space<vmem>>, vector<1x1x32x1xf32>
    %152 = vector.shape_cast %151 : vector<1x1x32x1xf32> to vector<32x1xf32>
    %153 = vector.broadcast %152 : vector<32x1xf32> to vector<32x128xf32>
    %154 = arith.addf %150, %153 : vector<32x128xf32>
    %cst_111 = arith.constant 0.000000e+00 : f32
    %155 = vector.broadcast %cst_111 : f32 to vector<32x128xf32>
    %156 = arith.maximumf %154, %155 : vector<32x128xf32>
    %157 = arith.addf %121, %156 : vector<32x128xf32>
    %158 = vector.extract_strided_slice %119 {offsets = [32, 0], sizes = [32, 128], strides = [1, 1]} : vector<64x128xf32> to vector<32x128xf32>
    %c1_112 = arith.constant 1 : index
    %c0_113 = arith.constant 0 : index
    %c0_114 = arith.constant 0 : index
    %c0_115 = arith.constant 0 : index
    %159 = vector.load %arg4[%c1_112, %c0_113, %c0_114, %c0_115] : memref<2x2x32x96xbf16, #tpu.memory_space<vmem>>, vector<1x1x32x96xbf16>
    %160 = vector.shape_cast %159 : vector<1x1x32x96xbf16> to vector<32x96xbf16>
    %c1_i32_116 = arith.constant 1 : i32
    %161 = tpu.dynamic_rotate %158 by %c1_i32_116 dim 1 : vector<32x128xf32>, i32 -> vector<32x128xf32>
    %cst_117 = arith.constant 0.000000e+00 : f32
    %162 = vector.broadcast %cst_117 : f32 to vector<32x128xf32>
    %163 = arith.select %6, %161, %162 : vector<32x128xi1>, vector<32x128xf32>
    %c127_i32_118 = arith.constant 127 : i32
    %164 = tpu.dynamic_rotate %158 by %c127_i32_118 dim 1 : vector<32x128xf32>, i32 -> vector<32x128xf32>
    %cst_119 = arith.constant 0.000000e+00 : f32
    %165 = vector.broadcast %cst_119 : f32 to vector<32x128xf32>
    %166 = arith.select %8, %164, %165 : vector<32x128xi1>, vector<32x128xf32>
    %167 = tpu.concatenate %163, %158, %166 in 0 : vector<32x128xf32>, vector<32x128xf32>, vector<32x128xf32> -> vector<96x128xf32>
    %168 = arith.truncf %167 : vector<96x128xf32> to vector<96x128xbf16>
    %cst_120 = arith.constant dense<0.000000e+00> : vector<32x128xf32>
    %169 = tpu.matmul %160, %168, %cst_120 {dimension_numbers = #tpu.dot_dimension_numbers<[1], [0], [0], [1], [0, 0, 1, 1], [], []>} : vector<32x96xbf16>, vector<96x128xbf16>, vector<32x128xf32> -> vector<32x128xf32>
    %c1_121 = arith.constant 1 : index
    %c0_122 = arith.constant 0 : index
    %c0_123 = arith.constant 0 : index
    %c0_124 = arith.constant 0 : index
    %170 = vector.load %arg5[%c1_121, %c0_122, %c0_123, %c0_124] : memref<2x2x32x1xf32, #tpu.memory_space<vmem>>, vector<1x1x32x1xf32>
    %171 = vector.shape_cast %170 : vector<1x1x32x1xf32> to vector<32x1xf32>
    %172 = vector.broadcast %171 : vector<32x1xf32> to vector<32x128xf32>
    %173 = arith.addf %169, %172 : vector<32x128xf32>
    %cst_125 = arith.constant 0.000000e+00 : f32
    %174 = vector.broadcast %cst_125 : f32 to vector<32x128xf32>
    %175 = arith.maximumf %173, %174 : vector<32x128xf32>
    %c1_126 = arith.constant 1 : index
    %c1_127 = arith.constant 1 : index
    %c0_128 = arith.constant 0 : index
    %c0_129 = arith.constant 0 : index
    %176 = vector.load %arg4[%c1_126, %c1_127, %c0_128, %c0_129] : memref<2x2x32x96xbf16, #tpu.memory_space<vmem>>, vector<1x1x32x96xbf16>
    %177 = vector.shape_cast %176 : vector<1x1x32x96xbf16> to vector<32x96xbf16>
    %c1_i32_130 = arith.constant 1 : i32
    %178 = tpu.dynamic_rotate %175 by %c1_i32_130 dim 1 : vector<32x128xf32>, i32 -> vector<32x128xf32>
    %cst_131 = arith.constant 0.000000e+00 : f32
    %179 = vector.broadcast %cst_131 : f32 to vector<32x128xf32>
    %180 = arith.select %6, %178, %179 : vector<32x128xi1>, vector<32x128xf32>
    %c127_i32_132 = arith.constant 127 : i32
    %181 = tpu.dynamic_rotate %175 by %c127_i32_132 dim 1 : vector<32x128xf32>, i32 -> vector<32x128xf32>
    %cst_133 = arith.constant 0.000000e+00 : f32
    %182 = vector.broadcast %cst_133 : f32 to vector<32x128xf32>
    %183 = arith.select %8, %181, %182 : vector<32x128xi1>, vector<32x128xf32>
    %184 = tpu.concatenate %180, %175, %183 in 0 : vector<32x128xf32>, vector<32x128xf32>, vector<32x128xf32> -> vector<96x128xf32>
    %185 = arith.truncf %184 : vector<96x128xf32> to vector<96x128xbf16>
    %cst_134 = arith.constant dense<0.000000e+00> : vector<32x128xf32>
    %186 = tpu.matmul %177, %185, %cst_134 {dimension_numbers = #tpu.dot_dimension_numbers<[1], [0], [0], [1], [0, 0, 1, 1], [], []>} : vector<32x96xbf16>, vector<96x128xbf16>, vector<32x128xf32> -> vector<32x128xf32>
    %c1_135 = arith.constant 1 : index
    %c1_136 = arith.constant 1 : index
    %c0_137 = arith.constant 0 : index
    %c0_138 = arith.constant 0 : index
    %187 = vector.load %arg5[%c1_135, %c1_136, %c0_137, %c0_138] : memref<2x2x32x1xf32, #tpu.memory_space<vmem>>, vector<1x1x32x1xf32>
    %188 = vector.shape_cast %187 : vector<1x1x32x1xf32> to vector<32x1xf32>
    %189 = vector.broadcast %188 : vector<32x1xf32> to vector<32x128xf32>
    %190 = arith.addf %186, %189 : vector<32x128xf32>
    %cst_139 = arith.constant 0.000000e+00 : f32
    %191 = vector.broadcast %cst_139 : f32 to vector<32x128xf32>
    %192 = arith.maximumf %190, %191 : vector<32x128xf32>
    %193 = arith.addf %157, %192 : vector<32x128xf32>
    %c1_140 = arith.constant 1 : index
    %c0_141 = arith.constant 0 : index
    %c0_142 = arith.constant 0 : index
    %194 = vector.load %arg6[%c1_140, %c0_141, %c0_142] : memref<2x32x128xf32, #tpu.memory_space<vmem>>, vector<1x32x128xf32>
    %195 = vector.shape_cast %194 : vector<1x32x128xf32> to vector<32x128xf32>
    %196 = vector.shape_cast %193 : vector<32x128xf32> to vector<1x32x128xf32>
    tpu.vector_store %arg6[%c1_140, %c0_141, %c0_142], %196 {strides = array<i32>} : memref<2x32x128xf32, #tpu.memory_space<vmem>>, vector<1x32x128xf32>,
    return
  }
  func.func @transform_0(%arg0: i32) -> (i32, i32, i32) {
    %c0_i32 = arith.constant 0 : i32
    %c0_i32_0 = arith.constant 0 : i32
    %c0_i32_1 = arith.constant 0 : i32
    return %arg0, %c0_i32, %c0_i32_0 : i32, i32, i32
  }
  func.func @transform_1(%arg0: i32) -> (i32, i32) {
    %c0_i32 = arith.constant 0 : i32
    %c0_i32_0 = arith.constant 0 : i32
    %c0_i32_1 = arith.constant 0 : i32
    return %c0_i32, %c0_i32_0 : i32, i32
  }
  func.func @transform_2(%arg0: i32) -> (i32, i32) {
    %c0_i32 = arith.constant 0 : i32
    %c0_i32_0 = arith.constant 0 : i32
    %c0_i32_1 = arith.constant 0 : i32
    return %c0_i32, %c0_i32_0 : i32, i32
  }
  func.func @transform_3(%arg0: i32) -> (i32, i32, i32, i32) {
    %c0_i32 = arith.constant 0 : i32
    %c0_i32_0 = arith.constant 0 : i32
    %c0_i32_1 = arith.constant 0 : i32
    %c0_i32_2 = arith.constant 0 : i32
    %c0_i32_3 = arith.constant 0 : i32
    return %c0_i32, %c0_i32_0, %c0_i32_1, %c0_i32_2 : i32, i32, i32, i32
  }
  func.func @transform_4(%arg0: i32) -> (i32, i32, i32, i32) {
    %c0_i32 = arith.constant 0 : i32
    %c0_i32_0 = arith.constant 0 : i32
    %c0_i32_1 = arith.constant 0 : i32
    %c0_i32_2 = arith.constant 0 : i32
    %c0_i32_3 = arith.constant 0 : i32
    return %c0_i32, %c0_i32_0, %c0_i32_1, %c0_i32_2 : i32, i32, i32, i32
  }
  func.func @transform_5(%arg0: i32) -> (i32, i32, i32) {
    %c0_i32 = arith.constant 0 : i32
    %c0_i32_0 = arith.constant 0 : i32
    %c0_i32_1 = arith.constant 0 : i32
    return %arg0, %c0_i32, %c0_i32_0 : i32, i32, i32
  }
}

</mosaic_0001>

<bundles_post_ra>
// kernel: tpu_custom_call.1
= control target key start
LH: loop header
LB: loop body
LE: loop exit
PB: predicated region body
PF: predicated region fallthrough
CT: control target
= control target key end

     0   :  { %10 = vsyncpa [#allocation3], 0  ;;  %s3397_s0 = inlined_call_operand.vmem [shape: f32[4,32,128], index: 0, kind: input, shape index: {}]   ;;  %s3398_s1 = inlined_call_operand.hbm [shape: bf16[64,96], index: 1, kind: input, shape index: {}]   ;;  %s3399_s2 = inlined_call_operand.vmem [shape: f32[64,1], index: 2, kind: input, shape index: {}]   ;;  %s3400_s3 = inlined_call_operand.vmem [shape: bf16[2,2,32,96], index: 3, kind: input, shape index: {}]   ;;  %s3401_s4 = inlined_call_operand.vmem [shape: f32[2,2,32,1], index: 4, kind: input, shape index: {}]   ;;  %s3402_s5 = inlined_call_operand.hbm [shape: f32[4,32,128], index: 5, kind: output, shape index: {}]  }
   0x1   :  { %11 = vsyncpa [#allocation4], 0 }
   0x2   :  { %13 = vsyncpa [#allocation4 + $0x1], 0  ;;  %s2708_s18 = smov 0   ;;  %s2710_s19 = smov 0  }
   0x3   :  { %s2712_s20 = smov 0   ;;  %s2714_s21 = smov 0  }
   0x4 LB: > { %s2729_s22 = sadd.s32 4294967295, %s2665_s21   ;;  %s1787_s23 = sadd.s32 4294967294, %s2665_s21   ;;  %s2665_s21 = sphi %s2714_s21, %s3418_s21   ;;  %s2661_s20 = sphi %s2712_s20, %s3417_s20   ;;  %s2657_s19 = sphi %s2710_s19, %s3416_s19   ;;  %s2653_s18 = sphi %s2708_s18, %s3415_s18  }
   0x5   : > { %s2733_s24 = sadd.s32 1, %s2665_s21   ;;  %s136_s25 = sadd.s32 1, %s2661_s20 }
   0x6   : > { %s133_s26 = ssub.s32 %s2665_s21, %s2733_s24  ;;  %p146_p0 = scmp.ne.s32.totalorder %s2661_s20, %s2657_s19 }
   0x7   : > { %p134_p1 = scmp.eq.s32.totalorder %s133_s26, 0  ;;  %p147_p2 = scmp.eq.s32.totalorder %s2729_s22, 1 }
   0x8   : > { %p152_p3 = scmp.ne.s32.totalorder %s2657_s19, %s2653_s18  ;;  %p153_p4 = scmp.eq.s32.totalorder %s1787_s23, 1 }
   0x9   : > { %s2744_s27 = scalar_select %p134_p1, %s2661_s20, %s136_s25  }
   0xa   : > { %p2746_p5 = por %p147_p2, %p146_p0  ;;  %p2750_p6 = por %p153_p4, %p152_p3 }
   0xb   : > { %p1788_p7 = scmp.ge.s32.totalorder %s2665_s21, 1  ;;  %p160_p8 = scmp.lt.s32.totalorder %s2665_s21, 3 }
   0xc   : > { %s3404_s29 = scalar_select %p2750_p6, 1, 0 }
   0xd   : > { %p2296_p9 = scmp.eq.s32.totalorder %s2729_s22, 0  ;;  %p2757_p10 = pnand %p1788_p7, %p160_p8 }
   0xe   : > { %s2667_s6 = smov [#allocation2]  }
   0xf   : > { %s172_s7 = sshll.u32 %s2667_s6, 4  ;;  %p2288_p11 = pneg %p2757_p10  ;;  %s173_s7 = int_to_ptr.vmem [resolvable:$true] %s172_s7 }
  0x10   : > { %s2586_s8 = scalar_lea.vmem %s173_s7, 512  ;;  %p2594_p3 = scmp.lt.s32.totalorder %s173_s7, %s173_s7 }
  0x11   : > { %p2289_p12 = pnand %p2296_p9, %p2288_p11  ;;  %p2587_p0 = scmp.ne.s32.totalorder %s173_s7, %s2586_s8 }
  0x12   : > { %p2595_p4 = scmp.lt.s32.totalorder %s2586_s8, %s2586_s8 }
  0x13   : > { %p2577_p13 = pneg %p2289_p12 }
  0x14   : > { %p2596_p6 = por %p2595_p4, %p2594_p3 }
  0x15   : > { %p2589_p1 = pnand %p2587_p0, %p2577_p13 }
  0x17   : > { %p2590_p2 = pneg %p2589_p1 }
  0x19   : > { %p2597_p7 = pnand %p2596_p6, %p2590_p2 }
  0x1b   : > { %2600 = shalt.err (!%p2597_p7)
}
  0x1c   : > { %s2668_s9 = smov 64   ;;  %s2669_s10 = smov 4  }
  0x1d   : > { %2291 = dma.hbm_to_vmem [thread:$0]  (!%p2289_p12), %s3398_s1, 512, %s173_s7, [#allocation3], %s2668_s9, %s2668_s9, %s2669_s10  }
  0x1e   : > { %207 = sbr.rel (%p2757_p10) target bundleno = 1581 (0x62d), region = 40 }
  0x23   : > { %2644 = dma.done.wait (%p2296_p9), [#allocation3], 512  }
  0x24   : > { %2646 = vsyncadd (%p2296_p9), [#allocation3], 4294966784  ;;  %s1794_s13 = sshll.u32 %s2729_s22, 1  ;;  %s2670_s23 = smov 126   ;;  %v2543_v6 = vld [vmem:[#allocation2] sm:$0xff]   ;;  %vm361_vm0 = vcmask 785408   ;;  %v245_v16 = vlaneseq }
  0x25   : > { %p237_p8 = scmp.lt.s32.totalorder %s1794_s13, 3  ;;  %s2671_s25 = smov 2   ;;  %2126 = vmatprep.mubr.msk.bf16.mxu0 %vm361_vm0, %v2543_v6  ;;  %v2792_v7 = vld [vmem:[%s3399_s2 + $0x18] sm:$0xff]  ;;  %v2797_v8 = vld [vmem:[%s3399_s2 + $0x10] sm:$0xff]  ;;  %v2672_v9 = vmov 0   ;;  %v2804_v10 = vld [vmem:[%s3399_s2] sm:$0xff] }
  0x26   : > { %2362 = vset.pattern.permute.xlu1 %v2672_v9  ;;  %2361 = vset.pattern.permute.xlu0 %v2672_v9  ;;  %v2809_v11 = vld [vmem:[%s3399_s2 + $0x8] sm:$0xff]  ;;  %v2816_v12 = vld [vmem:[%s3399_s2 + $0x30] sm:$0xff]  ;;  %v2821_v13 = vld [vmem:[%s3399_s2 + $0x38] sm:$0xff]  ;;  %v2837_v17 = vand.u32 127, %v245_v16  ;;  %s2673_s7 = smov 127   ;;  %s2674_s8 = smov 1  }
  0x27   : > { %s3420_s13 = smov (!%p237_p8, %s1794_s13), 3  ;;  %v2828_v14 = vld [vmem:[%s3399_s2 + $0x20] sm:$0xff]  ;;  %v2833_v15 = vld [vmem:[%s3399_s2 + $0x28] sm:$0xff]  ;;  %v2545_v39 = vld [vmem:[#allocation2 + $0x10] sm:$0xff]   ;;  %s2029_s6 = sshll.u32 %s2729_s22, 10 }
  0x28   : > { %s2027_s14 = sshll.u32 %s3420_s13, 5  ;;  %vm248_vm1 = vcmp.lt.s32.totalorder %v2837_v17, 126  ;;  %vm247_vm3 = vcmp.ge.s32.totalorder %v2837_v17, 2  ;;  %v2544_v38 = vld [vmem:[#allocation2 + $0x8] sm:$0xff]   ;;  %v2546_v40 = vld [vmem:[#allocation2 + $0x18] sm:$0xff]   ;;  %vm250_vm5 = vcmp.lt.s32.totalorder %v2837_v17, 127  ;;  %s3352_s10 = scalar_lea.hbm %s3402_s5, %s2029_s6 }
  0x29   : > { %s2778_s17 = scalar_lea.vmem %s3397_s0, %s2027_s14  ;;  %vm2840_vm2 = vmpackc.low %vm248_vm1, %vm248_vm1  ;;  %vm249_vm7 = vcmp.ge.s32.totalorder %v2837_v17, 1  ;;  %v2552_v21 = vld [vmem:[#allocation2 + $0x8] sm:$0xff]   ;;  %s2675_s12 = smov [#allocation5]  }
  0x2a   : > { %v253_v0 = vld [vmem:[%s2778_s17 + $0x10] sm:$0xff]  ;;  %v254_v1 = vld [vmem:[%s2778_s17 + $0x18] sm:$0xff]  ;;  %v251_v2 = vld [vmem:[%s2778_s17] sm:$0xff]  ;;  %s2605_s13 = sshll.u32 %s2675_s12, 4  ;;  %s2606_s13 = int_to_ptr.vmem [resolvable:$false] %s2605_s13 }
  0x2b   : > { %v2341_v3 = vpack.i.bf16 %v254_v1, %v253_v0  ;;  %v252_v4 = vld [vmem:[%s2778_s17 + $0x8] sm:$0xff]  ;;  %v290_v28 = vpack.c.bf16 %v254_v1, %v253_v0  ;;  %vm2853_vm4 = vmpackc.low %vm247_vm3, %vm247_vm3  ;;  %s2607_s14 = scalar_lea.vmem %s2606_s13, 2048 }
  0x2c   : > { %v2346_v5 = vpack.i.bf16 %v252_v4, %v251_v2  ;;  %v289_v31 = vpack.c.bf16 %v252_v4, %v251_v2  ;;  %vm2961_vm6 = vmpackc.low %vm250_vm5, %vm250_vm5 }
  0x2d   : > { %2342 = vrot.lane.b32.xlu0 %v2341_v3, %s2670_s23  ;;  %2352 = vrot.lane.b32.xlu1 %v2341_v3, %s2671_s25  ;;  %vm2977_vm8 = vmpackc.low %vm249_vm7, %vm249_vm7 }
  0x31   : > { %2347 = vrot.lane.b32.xlu0 %v2346_v5, %s2670_s23  ;;  %2357 = vrot.lane.b32.xlu1 %v2346_v5, %s2671_s25 }
  0x35   : > { %318 = vperm.xlu1 %2362, %v2792_v7   ;;  %313 = vperm.xlu0 %2361, %v2797_v8  }
  0x39   : > { %303 = vperm.xlu1 %2362, %v2804_v10   ;;  %308 = vperm.xlu0 %2361, %v2809_v11  }
  0x3d   : > { %333 = vperm.xlu1 %2362, %v2816_v12   ;;  %338 = vperm.xlu0 %2361, %v2821_v13  }
  0x41   : > { %323 = vperm.xlu1 %2362, %v2828_v14   ;;  %328 = vperm.xlu0 %2361, %v2833_v15  }
  0x9f   : > { %v2343_v18 = vpop.permute.xlu0 %2342  ;;  %v2353_v26 = vpop.permute.xlu1 %2352 }
  0xa0   : > { %v2345_v19 = vunpack.i.h.bf16 %v2343_v18  ;;  %v2344_v20 = vunpack.i.l.bf16 %v2343_v18  ;;  %v2355_v29 = vunpack.i.h.bf16 %v2353_v26  ;;  %v2354_v30 = vunpack.i.l.bf16 %v2353_v26 }
  0xa2   : > { %v1802_v22 = vpack.c.bf16 %v2345_v19, %v2344_v20  ;;  %v1808_v33 = vpack.c.bf16 %v2355_v29, %v2354_v30  ;;  %v2889_v29 = vld [vmem:[%s2778_s17 + $0x20] sm:$0xff]  ;;  %v2892_v30 = vld [vmem:[%s2778_s17 + $0x28] sm:$0xff] }
  0xa3   : > { %v2348_v23 = vpop.permute.xlu0 %2347  ;;  %v2358_v32 = vpop.permute.xlu1 %2357 }
  0xa4   : > { %v2350_v24 = vunpack.i.h.bf16 %v2348_v23  ;;  %v2349_v25 = vunpack.i.l.bf16 %v2348_v23  ;;  %2114 = vmatprep.subr.msk.bf16.mxu0 %vm2840_vm2, %v1802_v22  ;;  %v2360_v34 = vunpack.i.h.bf16 %v2358_v32  ;;  %v2359_v35 = vunpack.i.l.bf16 %v2358_v32  ;;  %v2547_v32 = vld [vmem:[%s3400_s3] sm:$0xff]  }
  0xa5   : > { %2115 = vmatpush3.bf16.msk.msra.mxu0 %vm2840_vm2, %v1802_v22  ;;  %2146 = vmatprep.mubr.msk.bf16.mxu1 %vm361_vm0, %v2547_v32  ;;  %v2551_v32 = vld [vmem:[#allocation2] sm:$0xff]  }
  0xa6   : > { %v1805_v27 = vpack.c.bf16 %v2350_v24, %v2349_v25  ;;  %v1811_v37 = vpack.c.bf16 %v2360_v34, %v2359_v35  ;;  %v2910_v34 = vld [vmem:[%s3401_s4 + $0x10] sm:$0xff]  ;;  %v2916_v35 = vld [vmem:[%s3401_s4 + $0x18] sm:$0xff] }
  0xa8   : > { %2116 = vmatprep.subr.msk.bf16.mxu0 %vm2840_vm2, %v1805_v27 }
  0xa9   : > { %2117 = vmatpush3.bf16.msk.msra.mxu0 %vm2840_vm2, %v1805_v27  ;;  %v2882_v27 = vld [vmem:[%s2778_s17 + $0x30] sm:$0xff] }
  0xaa   : > { %2118 = vmatprep.subr.bf16.mxu0 %v290_v28 }
  0xad   : > { %2119 = vmatpush3.bf16.msra.mxu0 %v290_v28  ;;  %v2885_v28 = vld [vmem:[%s2778_s17 + $0x38] sm:$0xff] }
  0xae   : > { %2120 = vmatprep.subr.bf16.mxu0 %v289_v31 }
  0xb0   : > { %v319_v41 = vpop.permute.xlu1 %318  ;;  %v314_v42 = vpop.permute.xlu0 %313 }
  0xb1   : > { %2121 = vmatpush3.bf16.msra.mxu0 %v289_v31  ;;  %v2403_v31 = vpack.i.bf16 %v2885_v28, %v2882_v27 }
  0xb2   : > { %2122 = vmatprep.subr.msk.bf16.mxu0 %vm2853_vm4, %v1808_v33 }
  0xb4   : > { %v304_v43 = vpop.permute.xlu1 %303  ;;  %v309_v45 = vpop.permute.xlu0 %308 }
  0xb5   : > { %2123 = vmatpush3.bf16.msk.msra.mxu0 %vm2853_vm4, %v1808_v33  ;;  %v2408_v33 = vpack.i.bf16 %v2892_v30, %v2889_v29 }
  0xb6   : > { %2124 = vmatprep.subr.msk.bf16.mxu0 %vm2853_vm4, %v1811_v37 }
  0xb8   : > { %v334_v51 = vpop.permute.xlu1 %333  ;;  %v339_v56 = vpop.permute.xlu0 %338 }
  0xb9   : > { %2125 = vmatpush3.bf16.msk.msra.mxu0 %vm2853_vm4, %v1811_v37  ;;  %v2922_v37 = vld [vmem:[%s3401_s4] sm:$0xff] }
  0xbc   : > { %2127 = vmatmul.mubr.msk.bf16.vlgmr.msra.gmra.mxu0 %vm361_vm0, %v2544_v38  ;;  %v324_v2 = vpop.permute.xlu1 %323  ;;  %v329_v6 = vpop.permute.xlu0 %328  ;;  %v2928_v38 = vld [vmem:[%s3401_s4 + $0x8] sm:$0xff] }
  0xbd   : > { %2130 = vmatprep.mubr.msk.bf16.mxu0 %vm361_vm0, %v2545_v39  ;;  %v2934_v39 = vld [vmem:[%s3401_s4 + $0x50] sm:$0xff] }
  0xc4   : > { %2131 = vmatmul.mubr.msk.bf16.gmra.mxu0 %vm361_vm0, %v2546_v40  ;;  %v2940_v40 = vld [vmem:[%s3401_s4 + $0x58] sm:$0xff] }
 0x17c   : > { %v2128_v44 = vpop.f32.mrf.mxu0 }
 0x17d   : > { %v417_v47 = vadd.f32 %v2128_v44, %v314_v42  ;;  %v2952_v42 = vld [vmem:[%s3401_s4 + $0x48] sm:$0xff] }
 0x17e   : > { %v408_v46 = vpop.f32.mrf.mxu0 }
 0x17f   : > { %v409_v49 = vadd.f32 %v408_v46, %v304_v43  ;;  %v441_v53 = vmax.f32 %v417_v47, 0.0 }
 0x180   : > { %v2129_v48 = vpop.f32.mrf.mxu0 }
 0x181   : > { %v420_v50 = vadd.f32 %v2129_v48, %v319_v41  ;;  %v439_v58 = vmax.f32 %v409_v49, 0.0  ;;  %v2946_v41 = vld [vmem:[%s3401_s4 + $0x40] sm:$0xff] }
 0x182   : > { %v411_v52 = vpop.f32.mrf.mxu0 }
 0x183   : > { %v442_v54 = vmax.f32 %v420_v50, 0.0  ;;  %v412_v55 = vadd.f32 %v411_v52, %v309_v45  ;;  %v2568_v52 = vld [vmem:[%s2778_s17 + $0x8] sm:$0xff] }
 0x184   : > { %v2132_v57 = vpop.f32.mrf.mxu0 }
 0x185   : > { %v440_v59 = vmax.f32 %v412_v55, 0.0  ;;  %v2363_v60 = vpack.i.bf16 %v442_v54, %v441_v53  ;;  %v2868_v61 = vpack.c.bf16 %v442_v54, %v441_v53  ;;  %v433_v63 = vadd.f32 %v2132_v57, %v334_v51 }
 0x186   : > { %v424_v62 = vpop.f32.mrf.mxu0 }
 0x187   : > { %2364 = vrot.lane.b32.xlu1 %v2363_v60, %s2673_s7  ;;  %v2368_v0 = vpack.i.bf16 %v440_v59, %v439_v58  ;;  %v2871_v1 = vpack.c.bf16 %v440_v59, %v439_v58  ;;  %v425_v4 = vadd.f32 %v424_v62, %v324_v2  ;;  %v445_v16 = vmax.f32 %v433_v63, 0.0  ;;  %v2548_v63 = vld [vmem:[%s3400_s3 + $0x8] sm:$0xff]  }
 0x188   : > { %v2133_v3 = vpop.f32.mrf.mxu0 }
 0x189   : > { %v436_v5 = vadd.f32 %v2133_v3, %v339_v56  ;;  %2369 = vrot.lane.b32.xlu0 %v2368_v0, %s2673_s7  ;;  %v443_v20 = vmax.f32 %v425_v4, 0.0 }
 0x18a   : > { %v427_v9 = vpop.f32.mrf.mxu0 }
 0x18b   : > { %v446_v18 = vmax.f32 %v436_v5, 0.0  ;;  %v428_v19 = vadd.f32 %v427_v9, %v329_v6  ;;  %2374 = vrot.lane.b32.xlu1 %v2363_v60, %s2674_s8 }
 0x18d   : > { %v444_v22 = vmax.f32 %v428_v19, 0.0  ;;  %2379 = vrot.lane.b32.xlu0 %v2368_v0, %s2674_s8  ;;  %v2383_v23 = vpack.i.bf16 %v446_v18, %v445_v16  ;;  %v2876_v24 = vpack.c.bf16 %v446_v18, %v445_v16  ;;  %v2549_v0 = vld [vmem:[%s3400_s3 + $0x20] sm:$0xff]  }
 0x18f   : > { %2384 = vrot.lane.b32.xlu1 %v2383_v23, %s2673_s7  ;;  %v2388_v25 = vpack.i.bf16 %v444_v22, %v443_v20  ;;  %v2879_v26 = vpack.c.bf16 %v444_v22, %v443_v20 }
 0x191   : > { %2389 = vrot.lane.b32.xlu0 %v2388_v25, %s2673_s7 }
 0x193   : > { %2394 = vrot.lane.b32.xlu1 %v2383_v23, %s2674_s8 }
 0x195   : > { %2399 = vrot.lane.b32.xlu0 %v2388_v25, %s2674_s8 }
 0x197   : > { %2404 = vrot.lane.b32.xlu1 %v2403_v31, %s2670_s23 }
 0x199   : > { %2409 = vrot.lane.b32.xlu0 %v2408_v33, %s2670_s23 }
 0x19b   : > { %2414 = vrot.lane.b32.xlu1 %v2403_v31, %s2671_s25 }
 0x19d   : > { %2419 = vrot.lane.b32.xlu0 %v2408_v33, %s2671_s25 }
 0x19f   : > { %501 = vperm.xlu1 %2362, %v2910_v34  }
 0x1a1   : > { %506 = vperm.xlu0 %2361, %v2916_v35  }
 0x1a3   : > { %491 = vperm.xlu1 %2362, %v2922_v37  }
 0x1a5   : > { %496 = vperm.xlu0 %2361, %v2928_v38  }
 0x1a7   : > { %763 = vperm.xlu1 %2362, %v2934_v39  }
 0x1a9   : > { %768 = vperm.xlu0 %2361, %v2940_v40  }
 0x1ab   : > { %753 = vperm.xlu1 %2362, %v2946_v41  }
 0x1ad   : > { %758 = vperm.xlu0 %2361, %v2952_v42  }
 0x1af   : > { %1040 = vperm.xlu1 %2362, %v2797_v8  }
 0x1b1   : > { %1045 = vperm.xlu0 %2361, %v2792_v7  }
 0x1b3   : > { %1030 = vperm.xlu1 %2362, %v2804_v10  }
 0x1b5   : > { %1035 = vperm.xlu0 %2361, %v2809_v11  }
 0x1f9   : > { %v2365_v43 = vpop.permute.xlu1 %2364 }
 0x1fa   : > { %v2367_v44 = vunpack.i.h.bf16 %v2365_v43  ;;  %v2366_v45 = vunpack.i.l.bf16 %v2365_v43  ;;  %v1017_v43 = vpack.c.bf16 %v2885_v28, %v2882_v27  ;;  %v2553_v27 = vld [vmem:[#allocation2 + $0x10] sm:$0xff]   ;;  %v2554_v28 = vld [vmem:[#allocation2 + $0x18] sm:$0xff]  }
 0x1fb   : > { %v2370_v47 = vpop.permute.xlu0 %2369 }
 0x1fc   : > { %v2372_v48 = vunpack.i.h.bf16 %v2370_v47  ;;  %v2371_v49 = vunpack.i.l.bf16 %v2370_v47  ;;  %v1820_v50 = vpack.c.bf16 %v2367_v44, %v2366_v45 }
 0x1fd   : > { %v2375_v7 = vpop.permute.xlu1 %2374 }
 0x1fe   : > { %v1823_v8 = vpack.c.bf16 %v2372_v48, %v2371_v49  ;;  %2134 = vmatprep.subr.msk.bf16.mxu1 %vm2961_vm6, %v1820_v50  ;;  %v2377_v10 = vunpack.i.h.bf16 %v2375_v7  ;;  %v2376_v11 = vunpack.i.l.bf16 %v2375_v7  ;;  %v1016_v48 = vpack.c.bf16 %v2892_v30, %v2889_v29 }
 0x1ff   : > { %2135 = vmatpush3.bf16.msk.msra.mxu1 %vm2961_vm6, %v1820_v50  ;;  %v2380_v51 = vpop.permute.xlu0 %2379 }
 0x200   : > { %2136 = vmatprep.subr.msk.bf16.mxu1 %vm2961_vm6, %v1823_v8  ;;  %v1826_v53 = vpack.c.bf16 %v2377_v10, %v2376_v11  ;;  %v2382_v54 = vunpack.i.h.bf16 %v2380_v51  ;;  %v2381_v55 = vunpack.i.l.bf16 %v2380_v51 }
 0x201   : > { %v2385_v56 = vpop.permute.xlu1 %2384 }
 0x202   : > { %v1829_v17 = vpack.c.bf16 %v2382_v54, %v2381_v55  ;;  %v2387_v57 = vunpack.i.h.bf16 %v2385_v56  ;;  %v2386_v58 = vunpack.i.l.bf16 %v2385_v56 }
 0x203   : > { %2137 = vmatpush3.bf16.msk.msra.mxu1 %vm2961_vm6, %v1823_v8  ;;  %v2390_v59 = vpop.permute.xlu0 %2389 }
 0x204   : > { %2138 = vmatprep.subr.bf16.mxu1 %v2868_v61  ;;  %v1868_v60 = vpack.c.bf16 %v2387_v57, %v2386_v58  ;;  %v2391_v62 = vunpack.i.l.bf16 %v2390_v59 }
 0x205   : > { %v2395_v2 = vpop.permute.xlu1 %2394 }
 0x206   : > { %v2397_v3 = vunpack.i.h.bf16 %v2395_v2  ;;  %v2396_v4 = vunpack.i.l.bf16 %v2395_v2 }
 0x207   : > { %2139 = vmatpush3.bf16.msra.mxu1 %v2868_v61  ;;  %v2392_v61 = vunpack.i.h.bf16 %v2390_v59  ;;  %v2400_v5 = vpop.permute.xlu0 %2399 }
 0x208   : > { %2140 = vmatprep.subr.bf16.mxu1 %v2871_v1  ;;  %v1874_v6 = vpack.c.bf16 %v2397_v3, %v2396_v4  ;;  %v2402_v9 = vunpack.i.h.bf16 %v2400_v5  ;;  %v2401_v16 = vunpack.i.l.bf16 %v2400_v5 }
 0x209   : > { %v2405_v18 = vpop.permute.xlu1 %2404 }
 0x20a   : > { %v2407_v19 = vunpack.i.h.bf16 %v2405_v18  ;;  %v2406_v20 = vunpack.i.l.bf16 %v2405_v18  ;;  %v1877_v22 = vpack.c.bf16 %v2402_v9, %v2401_v16 }
 0x20b   : > { %2141 = vmatpush3.bf16.msra.mxu1 %v2871_v1  ;;  %v1871_v1 = vpack.c.bf16 %v2392_v61, %v2391_v62  ;;  %v2410_v23 = vpop.permute.xlu0 %2409 }
 0x20c   : > { %2142 = vmatprep.subr.msk.bf16.mxu1 %vm2977_vm8, %v1826_v53  ;;  %v1914_v25 = vpack.c.bf16 %v2407_v19, %v2406_v20  ;;  %v2411_v31 = vunpack.i.l.bf16 %v2410_v23 }
 0x20d   : > { %v2415_v44 = vpop.permute.xlu1 %2414 }
 0x20e   : > { %v2417_v45 = vunpack.i.h.bf16 %v2415_v44  ;;  %v2416_v47 = vunpack.i.l.bf16 %v2415_v44 }
 0x20f   : > { %2143 = vmatpush3.bf16.msk.msra.mxu1 %vm2977_vm8, %v1826_v53  ;;  %v2420_v49 = vpop.permute.xlu0 %2419 }
 0x210   : > { %2144 = vmatprep.subr.msk.bf16.mxu1 %vm2977_vm8, %v1829_v17  ;;  %v1920_v50 = vpack.c.bf16 %v2417_v45, %v2416_v47  ;;  %v2422_v8 = vunpack.i.h.bf16 %v2420_v49  ;;  %v2421_v7 = vunpack.i.l.bf16 %v2420_v49 }
 0x212   : > { %v1923_v10 = vpack.c.bf16 %v2422_v8, %v2421_v7 }
 0x213   : > { %2145 = vmatpush3.bf16.msk.msra.mxu1 %vm2977_vm8, %v1829_v17 }
 0x214   : > { %2166 = vmatprep.subr.msk.bf16.mxu1 %vm2961_vm6, %v1868_v60 }
 0x216   : > { %2147 = vmatmul.mubr.msk.bf16.vlgmr.msra.gmra.mxu1 %vm361_vm0, %v2548_v63 }
 0x217   : > { %2167 = vmatpush3.bf16.msk.msra.mxu1 %vm2961_vm6, %v1868_v60  ;;  %2178 = vmatprep.mubr.msk.bf16.mxu1 %vm361_vm0, %v2549_v0 }
 0x218   : > { %2168 = vmatprep.subr.msk.bf16.mxu1 %vm2961_vm6, %v1871_v1 }
 0x21a   : > { %v502_v29 = vpop.permute.xlu1 %501 }
 0x21b   : > { %2169 = vmatpush3.bf16.msk.msra.mxu1 %vm2961_vm6, %v1871_v1 }
 0x21c   : > { %2170 = vmatprep.subr.bf16.mxu1 %v2876_v24  ;;  %v507_v30 = vpop.permute.xlu0 %506 }
 0x21e   : > { %v492_v54 = vpop.permute.xlu1 %491 }
 0x21f   : > { %2171 = vmatpush3.bf16.msra.mxu1 %v2876_v24  ;;  %v2412_v24 = vunpack.i.h.bf16 %v2410_v23 }
 0x220   : > { %2172 = vmatprep.subr.bf16.mxu1 %v2879_v26  ;;  %v497_v57 = vpop.permute.xlu0 %496 }
 0x221   : > { %v1917_v33 = vpack.c.bf16 %v2412_v24, %v2411_v31 }
 0x222   : > { %v764_v3 = vpop.permute.xlu1 %763 }
 0x223   : > { %2173 = vmatpush3.bf16.msra.mxu1 %v2879_v26  ;;  %v2550_v26 = vld [vmem:[%s3400_s3 + $0x28] sm:$0xff]  }
 0x224   : > { %2174 = vmatprep.subr.msk.bf16.mxu1 %vm2977_vm8, %v1874_v6  ;;  %v769_v4 = vpop.permute.xlu0 %768 }
 0x226   : > { %v754_v16 = vpop.permute.xlu1 %753 }
 0x227   : > { %2175 = vmatpush3.bf16.msk.msra.mxu1 %vm2977_vm8, %v1874_v6 }
 0x228   : > { %2176 = vmatprep.subr.msk.bf16.mxu1 %vm2977_vm8, %v1877_v22 }
 0x22b   : > { %2177 = vmatpush3.bf16.msk.msra.mxu1 %vm2977_vm8, %v1877_v22 }
 0x22c   : > { %2198 = vmatprep.subr.msk.bf16.mxu1 %vm2840_vm2, %v1914_v25 }
 0x22e   : > { %2179 = vmatmul.mubr.msk.bf16.vlgmr.msra.gmra.mxu1 %vm361_vm0, %v2550_v26 }
 0x22f   : > { %2199 = vmatpush3.bf16.msk.msra.mxu1 %vm2840_vm2, %v1914_v25  ;;  %2210 = vmatprep.mubr.msk.bf16.mxu1 %vm361_vm0, %v2551_v32 }
 0x230   : > { %2200 = vmatprep.subr.msk.bf16.mxu1 %vm2840_vm2, %v1917_v33 }
 0x233   : > { %2201 = vmatpush3.bf16.msk.msra.mxu1 %vm2840_vm2, %v1917_v33 }
 0x234   : > { %2202 = vmatprep.subr.bf16.mxu1 %v1017_v43 }
 0x237   : > { %2203 = vmatpush3.bf16.msra.mxu1 %v1017_v43  ;;  %v1041_v43 = vpop.permute.xlu1 %1040 }
 0x238   : > { %2204 = vmatprep.subr.bf16.mxu1 %v1016_v48 }
 0x23b   : > { %2205 = vmatpush3.bf16.msra.mxu1 %v1016_v48  ;;  %v1031_v49 = vpop.permute.xlu1 %1030 }
 0x23c   : > { %2206 = vmatprep.subr.msk.bf16.mxu1 %vm2853_vm4, %v1920_v50 }
 0x23f   : > { %2207 = vmatpush3.bf16.msk.msra.mxu1 %vm2853_vm4, %v1920_v50 }
 0x240   : > { %2208 = vmatprep.subr.msk.bf16.mxu1 %vm2853_vm4, %v1923_v10 }
 0x243   : > { %2209 = vmatpush3.bf16.msk.msra.mxu1 %vm2853_vm4, %v1923_v10 }
 0x246   : > { %2211 = vmatmul.mubr.msk.bf16.vlgmr.msra.gmra.mxu1 %vm361_vm0, %v2552_v21 }
 0x247   : > { %2214 = vmatprep.mubr.msk.bf16.mxu1 %vm361_vm0, %v2553_v27 }
 0x24e   : > { %2215 = vmatmul.mubr.msk.bf16.gmra.mxu1 %vm361_vm0, %v2554_v28 }
 0x2d6   : > { %v2148_v11 = vpop.f32.mrf.mxu1 }
 0x2d7   : > { %v568_v53 = vadd.f32 %v2148_v11, %v502_v29 }
 0x2d8   : > { %v559_v51 = vpop.f32.mrf.mxu1 }
 0x2d9   : > { %v560_v56 = vadd.f32 %v559_v51, %v492_v54  ;;  %v576_v58 = vmax.f32 %v568_v53, 0.0 }
 0x2da   : > { %v2149_v55 = vpop.f32.mrf.mxu1 }
 0x2db   : > { %v571_v17 = vadd.f32 %v2149_v55, %v507_v30  ;;  %v574_v61 = vmax.f32 %v560_v56, 0.0 }
 0x2dc   : > { %v562_v36 = vpop.f32.mrf.mxu1 }
 0x2dd   : > { %v577_v59 = vmax.f32 %v571_v17, 0.0  ;;  %v563_v60 = vadd.f32 %v562_v36, %v497_v57 }
 0x2df   : > { %v575_v62 = vmax.f32 %v563_v60, 0.0  ;;  %v2423_v63 = vpack.i.bf16 %v577_v59, %v576_v58  ;;  %v3046_v0 = vpack.c.bf16 %v577_v59, %v576_v58 }
 0x2e1   : > { %2424 = vrot.lane.b32.xlu1 %v2423_v63, %s2673_s7  ;;  %v2428_v1 = vpack.i.bf16 %v575_v62, %v574_v61  ;;  %v3049_v2 = vpack.c.bf16 %v575_v62, %v574_v61 }
 0x2e3   : > { %2429 = vrot.lane.b32.xlu0 %v2428_v1, %s2673_s7 }
 0x2e5   : > { %1060 = vperm.xlu1 %2362, %v2816_v12   ;;  %v759_v12 = vpop.permute.xlu0 %758 }
 0x2e7   : > { %1065 = vperm.xlu0 %2361, %v2821_v13   ;;  %v2555_v13 = vld [vmem:[%s3400_s3 + $0x10] sm:$0xff]  }
 0x2e8   : > { %2162 = vmatprep.mubr.msk.bf16.mxu0 %vm361_vm0, %v2555_v13 }
 0x2e9   : > { %1050 = vperm.xlu1 %2362, %v2828_v14   ;;  %v1046_v44 = vpop.permute.xlu0 %1045 }
 0x2eb   : > { %1055 = vperm.xlu0 %2361, %v2833_v15  }
 0x2ed   : > { %2434 = vrot.lane.b32.xlu1 %v2423_v63, %s2674_s8  ;;  %v1036_v10 = vpop.permute.xlu0 %1035 }
 0x2ee   : > { %v2180_v5 = vpop.f32.mrf.mxu1 }
 0x2ef   : > { %2439 = vrot.lane.b32.xlu0 %v2428_v1, %s2674_s8  ;;  %v830_v9 = vadd.f32 %v2180_v5, %v764_v3 }
 0x2f0   : > { %v821_v6 = vpop.f32.mrf.mxu1 }
 0x2f1   : > { %v822_v19 = vadd.f32 %v821_v6, %v754_v16  ;;  %v838_v14 = vmax.f32 %v830_v9, 0.0 }
 0x2f2   : > { %v2181_v18 = vpop.f32.mrf.mxu1 }
 0x2f3   : > { %v833_v20 = vadd.f32 %v2181_v18, %v769_v4  ;;  %v836_v25 = vmax.f32 %v822_v19, 0.0 }
 0x2f4   : > { %v824_v22 = vpop.f32.mrf.mxu1 }
 0x2f5   : > { %v839_v15 = vmax.f32 %v833_v20, 0.0  ;;  %v825_v23 = vadd.f32 %v824_v22, %v759_v12 }
 0x2f7   : > { %v837_v24 = vmax.f32 %v825_v23, 0.0  ;;  %v2443_v31 = vpack.i.bf16 %v839_v15, %v838_v14  ;;  %v3062_v26 = vpack.c.bf16 %v839_v15, %v838_v14 }
 0x2f9   : > { %2444 = vrot.lane.b32.xlu1 %v2443_v31, %s2673_s7  ;;  %v2448_v32 = vpack.i.bf16 %v837_v24, %v836_v25  ;;  %v3065_v33 = vpack.c.bf16 %v837_v24, %v836_v25 }
 0x2fb   : > { %2449 = vrot.lane.b32.xlu0 %v2448_v32, %s2673_s7 }
 0x2fd   : > { %2454 = vrot.lane.b32.xlu1 %v2443_v31, %s2674_s8 }
 0x2ff   : > { %2459 = vrot.lane.b32.xlu0 %v2448_v32, %s2674_s8 }
 0x306   : > { %v2212_v45 = vpop.f32.mrf.mxu1 }
 0x307   : > { %v1143_v48 = vadd.f32 %v2212_v45, %v1041_v43 }
 0x308   : > { %v1134_v47 = vpop.f32.mrf.mxu1 }
 0x309   : > { %v1135_v8 = vadd.f32 %v1134_v47, %v1031_v49  ;;  %v1167_v27 = vmax.f32 %v1143_v48, 0.0 }
 0x30a   : > { %v2213_v50 = vpop.f32.mrf.mxu1 }
 0x30b   : > { %v1146_v7 = vadd.f32 %v2213_v50, %v1046_v44  ;;  %v1165_v30 = vmax.f32 %v1135_v8, 0.0 }
 0x30c   : > { %v1137_v21 = vpop.f32.mrf.mxu1 }
 0x30d   : > { %v1168_v28 = vmax.f32 %v1146_v7, 0.0  ;;  %v1138_v29 = vadd.f32 %v1137_v21, %v1036_v10 }
 0x30e   : > { %v2216_v62 = vpop.f32.mrf.mxu1 }
 0x30f   : > { %v1166_v11 = vmax.f32 %v1138_v29, 0.0  ;;  %v2463_v51 = vpack.i.bf16 %v1168_v28, %v1167_v27  ;;  %v3070_v53 = vpack.c.bf16 %v1168_v28, %v1167_v27  ;;  %v2556_v27 = vld [vmem:[%s3400_s3 + $0x18] sm:$0xff]   ;;  %v2557_v28 = vld [vmem:[%s3400_s3 + $0x30] sm:$0xff]  }
 0x310   : > { %v1150_v63 = vpop.f32.mrf.mxu1 }
 0x311   : > { %2464 = vrot.lane.b32.xlu1 %v2463_v51, %s2673_s7  ;;  %v2468_v54 = vpack.i.bf16 %v1166_v11, %v1165_v30  ;;  %v3073_v55 = vpack.c.bf16 %v1166_v11, %v1165_v30 }
 0x312   : > { %v2217_v4 = vpop.f32.mrf.mxu1 }
 0x313   : > { %2469 = vrot.lane.b32.xlu0 %v2468_v54, %s2673_s7 }
 0x314   : > { %v1153_v20 = vpop.f32.mrf.mxu1 }
 0x315   : > { %2474 = vrot.lane.b32.xlu1 %v2463_v51, %s2674_s8 }
 0x317   : > { %2479 = vrot.lane.b32.xlu0 %v2468_v54, %s2674_s8 }
 0x353   : > { %v2425_v56 = vpop.permute.xlu1 %2424 }
 0x354   : > { %v2427_v17 = vunpack.i.h.bf16 %v2425_v56  ;;  %v2426_v57 = vunpack.i.l.bf16 %v2425_v56 }
 0x355   : > { %v2430_v36 = vpop.permute.xlu0 %2429 }
 0x356   : > { %v1844_v58 = vpack.c.bf16 %v2427_v17, %v2426_v57  ;;  %v2432_v59 = vunpack.i.h.bf16 %v2430_v36  ;;  %v2431_v60 = vunpack.i.l.bf16 %v2430_v36  ;;  %v2559_v57 = vld [vmem:[%s3400_s3] sm:$0xff]  }
 0x358   : > { %v1847_v61 = vpack.c.bf16 %v2432_v59, %v2431_v60  ;;  %2150 = vmatprep.subr.msk.bf16.mxu0 %vm2961_vm6, %v1844_v58 }
 0x359   : > { %2151 = vmatpush3.bf16.msk.msra.mxu0 %vm2961_vm6, %v1844_v58 }
 0x35a   : > { %2152 = vmatprep.subr.msk.bf16.mxu0 %vm2961_vm6, %v1847_v61 }
 0x35d   : > { %2153 = vmatpush3.bf16.msk.msra.mxu0 %vm2961_vm6, %v1847_v61 }
 0x35e   : > { %2154 = vmatprep.subr.bf16.mxu0 %v3046_v0 }
 0x360   : > { %v1061_v1 = vpop.permute.xlu1 %1060 }
 0x361   : > { %v1159_v3 = vadd.f32 %v2216_v62, %v1061_v1  ;;  %2155 = vmatpush3.bf16.msra.mxu0 %v3046_v0 }
 0x362   : > { %v1066_v5 = vpop.permute.xlu0 %1065  ;;  %2156 = vmatprep.subr.bf16.mxu0 %v3049_v2 }
 0x363   : > { %v1162_v6 = vadd.f32 %v2217_v4, %v1066_v5  ;;  %v1171_v16 = vmax.f32 %v1159_v3, 0.0 }
 0x364   : > { %v1051_v9 = vpop.permute.xlu1 %1050 }
 0x365   : > { %v1172_v18 = vmax.f32 %v1162_v6, 0.0  ;;  %v1151_v19 = vadd.f32 %v1150_v63, %v1051_v9  ;;  %2157 = vmatpush3.bf16.msra.mxu0 %v3049_v2 }
 0x366   : > { %v1056_v12 = vpop.permute.xlu0 %1055 }
 0x367   : > { %v1154_v22 = vadd.f32 %v1153_v20, %v1056_v12  ;;  %v2483_v13 = vpack.i.bf16 %v1172_v18, %v1171_v16  ;;  %v3090_v14 = vpack.c.bf16 %v1172_v18, %v1171_v16  ;;  %v1169_v23 = vmax.f32 %v1151_v19, 0.0 }
 0x368   : > { %v2435_v15 = vpop.permute.xlu1 %2434 }
 0x369   : > { %v1170_v0 = vmax.f32 %v1154_v22, 0.0  ;;  %v2437_v25 = vunpack.i.h.bf16 %v2435_v15  ;;  %v2436_v24 = vunpack.i.l.bf16 %v2435_v15  ;;  %2484 = vrot.lane.b32.xlu1 %v2483_v13, %s2673_s7 }
 0x36a   : > { %v2440_v31 = vpop.permute.xlu0 %2439 }
 0x36b   : > { %v1850_v32 = vpack.c.bf16 %v2437_v25, %v2436_v24  ;;  %v2442_v43 = vunpack.i.h.bf16 %v2440_v31  ;;  %v2441_v44 = vunpack.i.l.bf16 %v2440_v31  ;;  %v2488_v45 = vpack.i.bf16 %v1170_v0, %v1169_v23 }
 0x36c   : > { %v2445_v47 = vpop.permute.xlu1 %2444  ;;  %v3093_v2 = vpack.c.bf16 %v1170_v0, %v1169_v23 }
 0x36d   : > { %v1853_v48 = vpack.c.bf16 %v2442_v43, %v2441_v44  ;;  %2494 = vrot.lane.b32.xlu1 %v2483_v13, %s2674_s8  ;;  %2489 = vrot.lane.b32.xlu0 %v2488_v45, %s2673_s7  ;;  %v2447_v49 = vunpack.i.h.bf16 %v2445_v47  ;;  %v2446_v50 = vunpack.i.l.bf16 %v2445_v47 }
 0x36e   : > { %2158 = vmatprep.subr.msk.bf16.mxu0 %vm2977_vm8, %v1850_v32  ;;  %v2450_v8 = vpop.permute.xlu0 %2449 }
 0x36f   : > { %2159 = vmatpush3.bf16.msk.msra.mxu0 %vm2977_vm8, %v1850_v32  ;;  %v1892_v7 = vpack.c.bf16 %v2447_v49, %v2446_v50  ;;  %v2452_v10 = vunpack.i.h.bf16 %v2450_v8  ;;  %v2451_v21 = vunpack.i.l.bf16 %v2450_v8 }
 0x370   : > { %2160 = vmatprep.subr.msk.bf16.mxu0 %vm2977_vm8, %v1853_v48  ;;  %v2455_v29 = vpop.permute.xlu1 %2454 }
 0x371   : > { %1227 = vperm.xlu1 %2362, %v2910_v34   ;;  %2499 = vrot.lane.b32.xlu0 %v2488_v45, %s2674_s8  ;;  %v1895_v34 = vpack.c.bf16 %v2452_v10, %v2451_v21 }
 0x372   : > { %v2460_v30 = vpop.permute.xlu0 %2459 }
 0x373   : > { %2161 = vmatpush3.bf16.msk.msra.mxu0 %vm2977_vm8, %v1853_v48  ;;  %v2461_v11 = vunpack.i.l.bf16 %v2460_v30 }
 0x374   : > { %2182 = vmatprep.subr.msk.bf16.mxu0 %vm2961_vm6, %v1892_v7 }
 0x375   : > { %1217 = vperm.xlu1 %2362, %v2922_v37   ;;  %1232 = vperm.xlu0 %2361, %v2916_v35   ;;  %v2457_v35 = vunpack.i.h.bf16 %v2455_v29  ;;  %v2456_v37 = vunpack.i.l.bf16 %v2455_v29 }
 0x376   : > { %2163 = vmatmul.mubr.msk.bf16.vlgmr.msra.gmra.mxu0 %vm361_vm0, %v2556_v27 }
 0x377   : > { %2183 = vmatpush3.bf16.msk.msra.mxu0 %vm2961_vm6, %v1892_v7  ;;  %2194 = vmatprep.mubr.msk.bf16.mxu0 %vm361_vm0, %v2557_v28 }
 0x378   : > { %2184 = vmatprep.subr.msk.bf16.mxu0 %vm2961_vm6, %v1895_v34 }
 0x379   : > { %1485 = vperm.xlu1 %2362, %v2934_v39   ;;  %1222 = vperm.xlu0 %2361, %v2928_v38   ;;  %v1898_v38 = vpack.c.bf16 %v2457_v35, %v2456_v37  ;;  %v2462_v39 = vunpack.i.h.bf16 %v2460_v30 }
 0x37b   : > { %2185 = vmatpush3.bf16.msk.msra.mxu0 %vm2961_vm6, %v1895_v34 }
 0x37c   : > { %2186 = vmatprep.subr.bf16.mxu0 %v3062_v26 }
 0x37d   : > { %1475 = vperm.xlu1 %2362, %v2946_v41   ;;  %1490 = vperm.xlu0 %2361, %v2940_v40   ;;  %v1901_v41 = vpack.c.bf16 %v2462_v39, %v2461_v11 }
 0x37f   : > { %2187 = vmatpush3.bf16.msra.mxu0 %v3062_v26 }
 0x380   : > { %2188 = vmatprep.subr.bf16.mxu0 %v3065_v33 }
 0x381   : > { %1480 = vperm.xlu0 %2361, %v2952_v42  }
 0x383   : > { %2189 = vmatpush3.bf16.msra.mxu0 %v3065_v33  ;;  %v2465_v51 = vpop.permute.xlu1 %2464  ;;  %v2558_v33 = vld [vmem:[%s3400_s3 + $0x38] sm:$0xff]  }
 0x384   : > { %2190 = vmatprep.subr.msk.bf16.mxu0 %vm2977_vm8, %v1898_v38  ;;  %v2467_v40 = vunpack.i.h.bf16 %v2465_v51  ;;  %v2466_v54 = vunpack.i.l.bf16 %v2465_v51 }
 0x385   : > { %v2470_v56 = vpop.permute.xlu0 %2469 }
 0x386   : > { %v1932_v42 = vpack.c.bf16 %v2467_v40, %v2466_v54  ;;  %v2472_v26 = vunpack.i.h.bf16 %v2470_v56  ;;  %v2471_v17 = vunpack.i.l.bf16 %v2470_v56  ;;  %v2563_v56 = vld [vmem:[%s3400_s3 + $0x10] sm:$0xff]  }
 0x387   : > { %2191 = vmatpush3.bf16.msk.msra.mxu0 %vm2977_vm8, %v1898_v38  ;;  %v2475_v58 = vpop.permute.xlu1 %2474  ;;  %2246 = vmatprep.mubr.msk.bf16.mxu1 %vm361_vm0, %v2563_v56 }
 0x388   : > { %2192 = vmatprep.subr.msk.bf16.mxu0 %vm2977_vm8, %v1901_v41  ;;  %v1935_v36 = vpack.c.bf16 %v2472_v26, %v2471_v17  ;;  %v2477_v59 = vunpack.i.h.bf16 %v2475_v58  ;;  %v2476_v60 = vunpack.i.l.bf16 %v2475_v58 }
 0x389   : > { %v2480_v61 = vpop.permute.xlu0 %2479 }
 0x38a   : > { %v1938_v62 = vpack.c.bf16 %v2477_v59, %v2476_v60  ;;  %v2482_v63 = vunpack.i.h.bf16 %v2480_v61  ;;  %v2481_v1 = vunpack.i.l.bf16 %v2480_v61 }
 0x38b   : > { %2193 = vmatpush3.bf16.msk.msra.mxu0 %vm2977_vm8, %v1901_v41 }
 0x38c   : > { %2218 = vmatprep.subr.msk.bf16.mxu0 %vm2961_vm6, %v1932_v42  ;;  %v1941_v3 = vpack.c.bf16 %v2482_v63, %v2481_v1 }
 0x38e   : > { %2195 = vmatmul.mubr.msk.bf16.vlgmr.msra.gmra.mxu0 %vm361_vm0, %v2558_v33 }
 0x38f   : > { %2219 = vmatpush3.bf16.msk.msra.mxu0 %vm2961_vm6, %v1932_v42  ;;  %2230 = vmatprep.mubr.msk.bf16.mxu0 %vm361_vm0, %v2559_v57 }
 0x390   : > { %2220 = vmatprep.subr.msk.bf16.mxu0 %vm2961_vm6, %v1935_v36 }
 0x393   : > { %2221 = vmatpush3.bf16.msk.msra.mxu0 %vm2961_vm6, %v1935_v36 }
 0x394   : > { %2222 = vmatprep.subr.bf16.mxu0 %v3070_v53 }
 0x397   : > { %2223 = vmatpush3.bf16.msra.mxu0 %v3070_v53  ;;  %v2560_v53 = vld [vmem:[%s3400_s3 + $0x8] sm:$0xff]  }
 0x398   : > { %2224 = vmatprep.subr.bf16.mxu0 %v3073_v55 }
 0x39b   : > { %2225 = vmatpush3.bf16.msra.mxu0 %v3073_v55  ;;  %v2561_v55 = vld [vmem:[%s3400_s3 + $0x20] sm:$0xff]  }
 0x39c   : > { %2226 = vmatprep.subr.msk.bf16.mxu0 %vm2977_vm8, %v1938_v62 }
 0x39f   : > { %2227 = vmatpush3.bf16.msk.msra.mxu0 %vm2977_vm8, %v1938_v62 }
 0x3a0   : > { %2228 = vmatprep.subr.msk.bf16.mxu0 %vm2977_vm8, %v1941_v3 }
 0x3a3   : > { %2229 = vmatpush3.bf16.msk.msra.mxu0 %vm2977_vm8, %v1941_v3 }
 0x3a6   : > { %2231 = vmatmul.mubr.msk.bf16.vlgmr.msra.gmra.mxu0 %vm361_vm0, %v2560_v53 }
 0x3a7   : > { %2262 = vmatprep.mubr.msk.bf16.mxu0 %vm361_vm0, %v2561_v55 }
 0x3db   : > { %v2485_v4 = vpop.permute.xlu1 %2484 }
 0x3dc   : > { %v2487_v5 = vunpack.i.h.bf16 %v2485_v4  ;;  %v2486_v6 = vunpack.i.l.bf16 %v2485_v4 }
 0x3de   : > { %v1980_v9 = vpack.c.bf16 %v2487_v5, %v2486_v6 }
 0x3df   : > { %v2490_v16 = vpop.permute.xlu0 %2489  ;;  %v2495_v12 = vpop.permute.xlu1 %2494 }
 0x3e0   : > { %v2492_v18 = vunpack.i.h.bf16 %v2490_v16  ;;  %v2491_v19 = vunpack.i.l.bf16 %v2490_v16  ;;  %2250 = vmatprep.subr.msk.bf16.mxu0 %vm2961_vm6, %v1980_v9  ;;  %v2497_v22 = vunpack.i.h.bf16 %v2495_v12  ;;  %v2496_v13 = vunpack.i.l.bf16 %v2495_v12  ;;  %v1837_v16 = vld [vmem:[%s3401_s4 + $0x20] sm:$0xff] }
 0x3e1   : > { %2251 = vmatpush3.bf16.msk.msra.mxu0 %vm2961_vm6, %v1980_v9  ;;  %v1885_v12 = vld [vmem:[%s3401_s4 + $0x60] sm:$0xff] }
 0x3e2   : > { %v1983_v20 = vpack.c.bf16 %v2492_v18, %v2491_v19  ;;  %v1986_v23 = vpack.c.bf16 %v2497_v22, %v2496_v13  ;;  %v1838_v18 = vld [vmem:[%s3401_s4 + $0x28] sm:$0xff]  ;;  %v1839_v19 = vld [vmem:[%s3401_s4 + $0x30] sm:$0xff] }
 0x3e3   : > { %v2500_v15 = vpop.permute.xlu0 %2499  ;;  %v1886_v22 = vld [vmem:[%s3401_s4 + $0x68] sm:$0xff]  ;;  %v1887_v13 = vld [vmem:[%s3401_s4 + $0x70] sm:$0xff] }
 0x3e4   : > { %2252 = vmatprep.subr.msk.bf16.mxu0 %vm2961_vm6, %v1983_v20  ;;  %v2502_v0 = vunpack.i.h.bf16 %v2500_v15  ;;  %v2501_v25 = vunpack.i.l.bf16 %v2500_v15  ;;  %v1888_v15 = vld [vmem:[%s3401_s4 + $0x78] sm:$0xff] }
 0x3e5   : > { %2253 = vmatpush3.bf16.msk.msra.mxu0 %vm2961_vm6, %v1983_v20  ;;  %v1840_v20 = vld [vmem:[%s3401_s4 + $0x38] sm:$0xff] }
 0x3e6   : > { %2254 = vmatprep.subr.bf16.mxu0 %v3090_v14  ;;  %v1989_v24 = vpack.c.bf16 %v2502_v0, %v2501_v25 }
 0x3e9   : > { %2255 = vmatpush3.bf16.msra.mxu0 %v3090_v14  ;;  %v2562_v14 = vld [vmem:[%s3400_s3 + $0x28] sm:$0xff]  }
 0x3ea   : > { %2256 = vmatprep.subr.bf16.mxu0 %v3093_v2 }
 0x3ec   : > { %v1228_v49 = vpop.permute.xlu1 %1227 }
 0x3ed   : > { %2257 = vmatpush3.bf16.msra.mxu0 %v3093_v2 }
 0x3ee   : > { %2258 = vmatprep.subr.msk.bf16.mxu0 %vm2977_vm8, %v1986_v23 }
 0x3f0   : > { %v1233_v50 = vpop.permute.xlu0 %1232  ;;  %v1218_v21 = vpop.permute.xlu1 %1217 }
 0x3f1   : > { %2259 = vmatpush3.bf16.msk.msra.mxu0 %vm2977_vm8, %v1986_v23 }
 0x3f2   : > { %2260 = vmatprep.subr.msk.bf16.mxu0 %vm2977_vm8, %v1989_v24 }
 0x3f4   : > { %v1223_v29 = vpop.permute.xlu0 %1222  ;;  %v1486_v42 = vpop.permute.xlu1 %1485 }
 0x3f5   : > { %2261 = vmatpush3.bf16.msk.msra.mxu0 %vm2977_vm8, %v1989_v24 }
 0x3f8   : > { %2263 = vmatmul.mubr.msk.bf16.vlgmr.msra.gmra.mxu0 %vm361_vm0, %v2562_v14  ;;  %v1491_v26 = vpop.permute.xlu0 %1490  ;;  %v1476_v36 = vpop.permute.xlu1 %1475 }
 0x3fc   : > { %v1481_v61 = vpop.permute.xlu0 %1480 }
 0x436   : > { %v3202_v31 = vpop.f32.mrf.mxu0 }
 0x438   : > { %v3204_v32 = vpop.f32.mrf.mxu0 }
 0x43a   : > { %v3206_v43 = vpop.f32.mrf.mxu0 }
 0x43c   : > { %v3208_v44 = vpop.f32.mrf.mxu0 }
 0x44e   : > { %v3210_v45 = vpop.f32.mrf.mxu0 }
 0x450   : > { %v3212_v47 = vpop.f32.mrf.mxu0 }
 0x452   : > { %v3214_v2 = vpop.f32.mrf.mxu0 }
 0x454   : > { %v3216_v48 = vpop.f32.mrf.mxu0 }
 0x466   : > { %v2232_v8 = vpop.f32.mrf.mxu0 }
 0x467   : > { %v1294_v10 = vadd.f32 %v2232_v8, %v1228_v49 }
 0x468   : > { %v1285_v7 = vpop.f32.mrf.mxu0 }
 0x469   : > { %v1286_v28 = vadd.f32 %v1285_v7, %v1218_v21  ;;  %v1302_v37 = vmax.f32 %v1294_v10, 0.0 }
 0x46a   : > { %v2233_v27 = vpop.f32.mrf.mxu0 }
 0x46b   : > { %v1297_v34 = vadd.f32 %v2233_v27, %v1233_v50  ;;  %v1300_v39 = vmax.f32 %v1286_v28, 0.0 }
 0x46c   : > { %v1288_v35 = vpop.f32.mrf.mxu0 }
 0x46d   : > { %v1303_v30 = vmax.f32 %v1297_v34, 0.0  ;;  %v1289_v38 = vadd.f32 %v1288_v35, %v1223_v29 }
 0x46f   : > { %v1301_v11 = vmax.f32 %v1289_v38, 0.0  ;;  %v2503_v51 = vpack.i.bf16 %v1303_v30, %v1302_v37  ;;  %v3218_v41 = vpack.c.bf16 %v1303_v30, %v1302_v37  ;;  %v2564_v37 = vld [vmem:[%s3400_s3 + $0x18] sm:$0xff]   ;;  %v2565_v30 = vld [vmem:[%s3400_s3 + $0x30] sm:$0xff]  }
 0x471   : > { %2504 = vrot.lane.b32.xlu1 %v2503_v51, %s2673_s7  ;;  %v2508_v40 = vpack.i.bf16 %v1301_v11, %v1300_v39  ;;  %v3221_v54 = vpack.c.bf16 %v1301_v11, %v1300_v39 }
 0x473   : > { %2509 = vrot.lane.b32.xlu0 %v2508_v40, %s2673_s7 }
 0x475   : > { %2514 = vrot.lane.b32.xlu1 %v2503_v51, %s2674_s8 }
 0x477   : > { %2519 = vrot.lane.b32.xlu0 %v2508_v40, %s2674_s8 }
 0x4b8   : > { %v2264_v17 = vpop.f32.mrf.mxu0 }
 0x4b9   : > { %v1552_v57 = vadd.f32 %v2264_v17, %v1486_v42 }
 0x4ba   : > { %v1543_v33 = vpop.f32.mrf.mxu0 }
 0x4bb   : > { %v1544_v59 = vadd.f32 %v1543_v33, %v1476_v36  ;;  %v1560_v63 = vmax.f32 %v1552_v57, 0.0 }
 0x4bc   : > { %v2265_v58 = vpop.f32.mrf.mxu0 }
 0x4bd   : > { %v1555_v60 = vadd.f32 %v2265_v58, %v1491_v26  ;;  %v1558_v53 = vmax.f32 %v1544_v59, 0.0 }
 0x4be   : > { %v1546_v62 = vpop.f32.mrf.mxu0 }
 0x4bf   : > { %v1561_v1 = vmax.f32 %v1555_v60, 0.0  ;;  %v1547_v3 = vadd.f32 %v1546_v62, %v1481_v61 }
 0x4c1   : > { %v1559_v55 = vmax.f32 %v1547_v3, 0.0  ;;  %v2523_v4 = vpack.i.bf16 %v1561_v1, %v1560_v63  ;;  %v3230_v5 = vpack.c.bf16 %v1561_v1, %v1560_v63  ;;  %v2566_v1 = vld [vmem:[%s3400_s3 + $0x38] sm:$0xff]  }
 0x4c3   : > { %2524 = vrot.lane.b32.xlu1 %v2523_v4, %s2673_s7  ;;  %v2528_v6 = vpack.i.bf16 %v1559_v55, %v1558_v53  ;;  %v3233_v9 = vpack.c.bf16 %v1559_v55, %v1558_v53 }
 0x4c5   : > { %2529 = vrot.lane.b32.xlu0 %v2528_v6, %s2673_s7  ;;  %s233_s7 = sand.u32 1, %s2657_s19  }
 0x4c6   : > { %s3357_s11 = scalar_lea.sflag [#allocation4], %s233_s7 }
 0x4c7   : > { %2534 = vrot.lane.b32.xlu1 %v2523_v4, %s2674_s8 }
 0x4c9   : > { %2539 = vrot.lane.b32.xlu0 %v2528_v6, %s2674_s8  ;;  %v2567_v6 = vld [vmem:[%s2778_s17] sm:$0xff]  ;;  %s1793_s8 = sshll.u32 %s233_s7, 6 }
 0x4ca   : > { %s3330_s25 = scalar_lea.vmem [#allocation5], %s1793_s8 }
 0x4cb   : > { %620 = vperm.xlu1 %2362, %v1837_v16   ;;  %s1713_s30 = sshll.u32 %s3330_s25, 4  ;;  %s3346_s30 = int_to_ptr.vmem [resolvable:$true] %s1713_s30 }
 0x4cc   : > { %s2601_s22 = scalar_lea.vmem %s3346_s30, 1024  ;;  %p2608_p11 = scmp.lt.s32.totalorder %s3346_s30, %s2606_s13 }
 0x4cd   : > { %625 = vperm.xlu0 %2361, %v1838_v18   ;;  %p2602_p6 = scmp.ne.s32.totalorder %s3346_s30, %s2601_s22  ;;  %p2609_p12 = scmp.lt.s32.totalorder %s2607_s14, %s2601_s22 }
 0x4cf   : > { %630 = vperm.xlu1 %2362, %v1839_v19   ;;  %p2603_p9 = pnand %p2602_p6, %p2746_p5  ;;  %p2610_p13 = por %p2609_p12, %p2608_p11 }
 0x4d1   : > { %635 = vperm.xlu0 %2361, %v1840_v20   ;;  %p2604_p10 = pneg %p2603_p9 }
 0x4d3   : > { %1344 = vperm.xlu1 %2362, %v1837_v16   ;;  %p2611_p0 = pnand %p2610_p13, %p2604_p10 }
 0x4d5   : > { %1349 = vperm.xlu0 %2361, %v1838_v18  }
 0x4d7   : > { %1354 = vperm.xlu1 %2362, %v1839_v19   ;;  %v448_v19 = vmul.f32 5.0, %v2568_v52 }
 0x4d9   : > { %1359 = vperm.xlu0 %2361, %v1840_v20  }
 0x4db   : > { %882 = vperm.xlu1 %2362, %v1885_v12  }
 0x4dd   : > { %887 = vperm.xlu0 %2361, %v1886_v22  }
 0x4df   : > { %892 = vperm.xlu1 %2362, %v1887_v13  }
 0x4e1   : > { %897 = vperm.xlu0 %2361, %v1888_v15  }
 0x4e3   : > { %v2505_v23 = vpop.permute.xlu1 %2504  ;;  %1602 = vperm.xlu1 %2362, %v1885_v12  }
 0x4e4   : > { %v2507_v0 = vunpack.i.h.bf16 %v2505_v23  ;;  %v2506_v25 = vunpack.i.l.bf16 %v2505_v23 }
 0x4e5   : > { %v2510_v24 = vpop.permute.xlu0 %2509  ;;  %1607 = vperm.xlu0 %2361, %v1886_v22   ;;  %v2569_v22 = vld [vmem:[%s2778_s17 + $0x10] sm:$0xff] }
 0x4e6   : > { %v1956_v14 = vpack.c.bf16 %v2507_v0, %v2506_v25  ;;  %v2512_v49 = vunpack.i.h.bf16 %v2510_v24  ;;  %v2511_v50 = vunpack.i.l.bf16 %v2510_v24 }
 0x4e7   : > { %1612 = vperm.xlu1 %2362, %v1887_v13   ;;  %v2515_v7 = vpop.permute.xlu1 %2514  ;;  %v449_v13 = vmul.f32 5.0, %v2569_v22 }
 0x4e8   : > { %v1959_v8 = vpack.c.bf16 %v2512_v49, %v2511_v50  ;;  %2234 = vmatprep.subr.msk.bf16.mxu1 %vm2961_vm6, %v1956_v14  ;;  %v2517_v10 = vunpack.i.h.bf16 %v2515_v7  ;;  %v2516_v21 = vunpack.i.l.bf16 %v2515_v7 }
 0x4e9   : > { %2235 = vmatpush3.bf16.msk.msra.mxu1 %vm2961_vm6, %v1956_v14  ;;  %1617 = vperm.xlu0 %2361, %v1888_v15   ;;  %v2520_v27 = vpop.permute.xlu0 %2519  ;;  %v2570_v14 = vld [vmem:[%s2778_s17 + $0x18] sm:$0xff] }
 0x4ea   : > { %2236 = vmatprep.subr.msk.bf16.mxu1 %vm2961_vm6, %v1959_v8  ;;  %v1962_v28 = vpack.c.bf16 %v2517_v10, %v2516_v21  ;;  %v2522_v34 = vunpack.i.h.bf16 %v2520_v27  ;;  %v2521_v29 = vunpack.i.l.bf16 %v2520_v27  ;;  %v450_v49 = vmul.f32 5.0, %v2570_v14 }
 0x4ec   : > { %v1965_v35 = vpack.c.bf16 %v2522_v34, %v2521_v29 }
 0x4ed   : > { %2237 = vmatpush3.bf16.msk.msra.mxu1 %vm2961_vm6, %v1959_v8 }
 0x4ee   : > { %2238 = vmatprep.subr.bf16.mxu1 %v3218_v41 }
 0x4f1   : > { %2239 = vmatpush3.bf16.msra.mxu1 %v3218_v41 }
 0x4f2   : > { %2240 = vmatprep.subr.bf16.mxu1 %v3221_v54 }
 0x4f5   : > { %2241 = vmatpush3.bf16.msra.mxu1 %v3221_v54 }
 0x4f6   : > { %2242 = vmatprep.subr.msk.bf16.mxu1 %vm2977_vm8, %v1962_v28 }
 0x4f9   : > { %2243 = vmatpush3.bf16.msk.msra.mxu1 %vm2977_vm8, %v1962_v28 }
 0x4fa   : > { %2244 = vmatprep.subr.msk.bf16.mxu1 %vm2977_vm8, %v1965_v35 }
 0x4fd   : > { %2245 = vmatpush3.bf16.msk.msra.mxu1 %vm2977_vm8, %v1965_v35 }
 0x500   : > { %2247 = vmatmul.mubr.msk.bf16.vlgmr.msra.gmra.mxu1 %vm361_vm0, %v2564_v37 }
 0x501   : > { %2278 = vmatprep.mubr.msk.bf16.mxu1 %vm361_vm0, %v2565_v30 }
 0x535   : > { %v2525_v38 = vpop.permute.xlu1 %2524 }
 0x536   : > { %v2527_v39 = vunpack.i.h.bf16 %v2525_v38  ;;  %v2526_v11 = vunpack.i.l.bf16 %v2525_v38 }
 0x537   : > { %v2530_v51 = vpop.permute.xlu0 %2529 }
 0x538   : > { %v2004_v41 = vpack.c.bf16 %v2527_v39, %v2526_v11  ;;  %v2532_v40 = vunpack.i.h.bf16 %v2530_v51  ;;  %v2531_v54 = vunpack.i.l.bf16 %v2530_v51 }
 0x539   : > { %v2535_v42 = vpop.permute.xlu1 %2534 }
 0x53a   : > { %v2007_v56 = vpack.c.bf16 %v2532_v40, %v2531_v54  ;;  %2266 = vmatprep.subr.msk.bf16.mxu1 %vm2961_vm6, %v2004_v41  ;;  %v2537_v26 = vunpack.i.h.bf16 %v2535_v42  ;;  %v2536_v17 = vunpack.i.l.bf16 %v2535_v42  ;;  %v2571_v54 = vld [vmem:[%s2778_s17 + $0x30] sm:$0xff] }
 0x53b   : > { %2267 = vmatpush3.bf16.msk.msra.mxu1 %vm2961_vm6, %v2004_v41  ;;  %v2540_v33 = vpop.permute.xlu0 %2539 }
 0x53c   : > { %2268 = vmatprep.subr.msk.bf16.mxu1 %vm2961_vm6, %v2007_v56  ;;  %v2010_v57 = vpack.c.bf16 %v2537_v26, %v2536_v17  ;;  %v2542_v36 = vunpack.i.h.bf16 %v2540_v33  ;;  %v2541_v58 = vunpack.i.l.bf16 %v2540_v33  ;;  %v2572_v17 = vld [vmem:[%s2778_s17 + $0x20] sm:$0xff] }
 0x53d   : > { %v1173_v33 = vmul.f32 5.0, %v2572_v17 }
 0x53e   : > { %v2013_v46 = vpack.c.bf16 %v2542_v36, %v2541_v58 }
 0x53f   : > { %2269 = vmatpush3.bf16.msk.msra.mxu1 %vm2961_vm6, %v2007_v56 }
 0x540   : > { %2270 = vmatprep.subr.bf16.mxu1 %v3230_v5 }
 0x543   : > { %2271 = vmatpush3.bf16.msra.mxu1 %v3230_v5 }
 0x544   : > { %2272 = vmatprep.subr.bf16.mxu1 %v3233_v9 }
 0x546   : > { %v621_v59 = vpop.permute.xlu1 %620 }
 0x547   : > { %2273 = vmatpush3.bf16.msra.mxu1 %v3233_v9  ;;  %v689_v53 = vadd.f32 %v3204_v32, %v621_v59  ;;  %v447_v9 = vmul.f32 5.0, %v2567_v6 }
 0x548   : > { %v626_v60 = vpop.permute.xlu0 %625  ;;  %2274 = vmatprep.subr.msk.bf16.mxu1 %vm2977_vm8, %v2010_v57 }
 0x549   : > { %v692_v55 = vadd.f32 %v3208_v44, %v626_v60  ;;  %v703_v16 = vmax.f32 %v689_v53, 0.0  ;;  %v2573_v60 = vld [vmem:[%s2778_s17 + $0x38] sm:$0xff] }
 0x54a   : > { %v631_v61 = vpop.permute.xlu1 %630 }
 0x54b   : > { %2275 = vmatpush3.bf16.msk.msra.mxu1 %vm2977_vm8, %v2010_v57  ;;  %v697_v18 = vadd.f32 %v3202_v31, %v631_v61  ;;  %v704_v20 = vmax.f32 %v692_v55, 0.0  ;;  %v707_v23 = vadd.f32 %v703_v16, %v447_v9 }
 0x54c   : > { %v636_v62 = vpop.permute.xlu0 %635  ;;  %2276 = vmatprep.subr.msk.bf16.mxu1 %vm2977_vm8, %v2013_v46 }
 0x54d   : > { %v700_v32 = vadd.f32 %v3206_v43, %v636_v62  ;;  %v705_v0 = vmax.f32 %v697_v18, 0.0  ;;  %v708_v31 = vadd.f32 %v704_v20, %v448_v19 }
 0x54e   : > { %v1345_v63 = vpop.permute.xlu1 %1344 }
 0x54f   : > { %2277 = vmatpush3.bf16.msk.msra.mxu1 %vm2977_vm8, %v2013_v46  ;;  %v706_v8 = vmax.f32 %v700_v32, 0.0  ;;  %v709_v27 = vadd.f32 %v705_v0, %v449_v13  ;;  %v1176_v46 = vmul.f32 5.0, %v2573_v60 }
 0x550   : > { %v3313_v3 = vpop.permute.xlu0 %1349 }
 0x551   : > { %v710_v34 = vadd.f32 %v706_v8, %v450_v49 }
 0x552   : > { %v1355_v4 = vpop.permute.xlu1 %1354  ;;  %2279 = vmatmul.mubr.msk.bf16.vlgmr.msra.gmra.mxu1 %vm361_vm0, %v2566_v1 }
 0x554   : > { %v1360_v5 = vpop.permute.xlu0 %1359 }
 0x556   : > { %v883_v12 = vpop.permute.xlu1 %882 }
 0x557   : > { %v951_v44 = vadd.f32 %v3212_v47, %v883_v12 }
 0x558   : > { %v888_v15 = vpop.permute.xlu0 %887 }
 0x559   : > { %v965_v25 = vmax.f32 %v951_v44, 0.0  ;;  %v954_v24 = vadd.f32 %v3216_v48, %v888_v15 }
 0x55a   : > { %v893_v50 = vpop.permute.xlu1 %892 }
 0x55b   : > { %v969_v7 = vadd.f32 %v965_v25, %v707_v23  ;;  %v966_v10 = vmax.f32 %v954_v24, 0.0  ;;  %v959_v43 = vadd.f32 %v3210_v45, %v893_v50 }
 0x55c   : > { %v898_v21 = vpop.permute.xlu0 %897 }
 0x55d   : > { %973 = vst [vmem:[%s3330_s25] sm:$0xff] %v969_v7  ;;  %v970_v47 = vadd.f32 %v966_v10, %v708_v31  ;;  %v967_v48 = vmax.f32 %v959_v43, 0.0  ;;  %v962_v28 = vadd.f32 %v3214_v2, %v898_v21  ;;  %v1175_v2 = vmul.f32 5.0, %v2571_v54 }
 0x55e   : > { %v1603_v38 = vpop.permute.xlu1 %1602 }
 0x55f   : > { %974 = vst [vmem:[%s3330_s25 + $0x8] sm:$0xff] %v970_v47  ;;  %v971_v29 = vadd.f32 %v967_v48, %v709_v27  ;;  %v968_v35 = vmax.f32 %v962_v28, 0.0 }
 0x560   : > { %v1608_v41 = vpop.permute.xlu0 %1607 }
 0x561   : > { %975 = vst [vmem:[%s3330_s25 + $0x10] sm:$0xff] %v971_v29  ;;  %v972_v45 = vadd.f32 %v968_v35, %v710_v34 }
 0x562   : > { %v1613_v26 = vpop.permute.xlu1 %1612 }
 0x563   : > { %976 = vst [vmem:[%s3330_s25 + $0x18] sm:$0xff] %v972_v45 }
 0x564   : > { %v1618_v55 = vpop.permute.xlu0 %1617 }
 0x5c0   : > { %v2248_v37 = vpop.f32.mrf.mxu1 }
 0x5c1   : > { %v1421_v11 = vadd.f32 %v2248_v37, %v1355_v4 }
 0x5c2   : > { %v1412_v30 = vpop.f32.mrf.mxu1 }
 0x5c3   : > { %v1413_v51 = vadd.f32 %v1412_v30, %v1345_v63  ;;  %v1429_v56 = vmax.f32 %v1421_v11, 0.0 }
 0x5c4   : > { %v2249_v39 = vpop.f32.mrf.mxu1 }
 0x5c5   : > { %v1424_v42 = vadd.f32 %v2249_v39, %v1360_v5  ;;  %v1427_v57 = vmax.f32 %v1413_v51, 0.0  ;;  %v1433_v62 = vadd.f32 %v1429_v56, %v1175_v2  ;;  %v2574_v5 = vld [vmem:[%s2778_s17 + $0x28] sm:$0xff] }
 0x5c6   : > { %v1415_v40 = vpop.f32.mrf.mxu1  ;;  %v1174_v6 = vmul.f32 5.0, %v2574_v5 }
 0x5c7   : > { %v1416_v58 = vadd.f32 %v1415_v40, %v3313_v3  ;;  %v1430_v63 = vmax.f32 %v1424_v42, 0.0  ;;  %v1431_v4 = vadd.f32 %v1427_v57, %v1173_v33 }
 0x5c9   : > { %v1428_v16 = vmax.f32 %v1416_v58, 0.0  ;;  %v1434_v20 = vadd.f32 %v1430_v63, %v1176_v46 }
 0x5cb   : > { %v1432_v22 = vadd.f32 %v1428_v16, %v1174_v6 }
 0x612   : > { %v2280_v36 = vpop.f32.mrf.mxu1 }
 0x613   : > { %v1679_v59 = vadd.f32 %v2280_v36, %v1613_v26 }
 0x614   : > { %v1670_v61 = vpop.f32.mrf.mxu1 }
 0x615   : > { %v1687_v1 = vmax.f32 %v1679_v59, 0.0  ;;  %v1671_v53 = vadd.f32 %v1670_v61, %v1603_v38 }
 0x616   : > { %v2281_v9 = vpop.f32.mrf.mxu1 }
 0x617   : > { %v1691_v18 = vadd.f32 %v1687_v1, %v1433_v62  ;;  %v1685_v3 = vmax.f32 %v1671_v53, 0.0  ;;  %v1682_v52 = vadd.f32 %v2281_v9, %v1618_v55 }
 0x618   : > { %v1673_v19 = vpop.f32.mrf.mxu1 }
 0x619   : > { %2019 = vst [vmem:[%s3330_s25 + $0x30] sm:$0xff] %v1691_v18  ;;  %v1689_v12 = vadd.f32 %v1685_v3, %v1431_v4  ;;  %v1688_v32 = vmax.f32 %v1682_v52, 0.0  ;;  %v1674_v44 = vadd.f32 %v1673_v19, %v1608_v41 }
 0x61b   : > { %2017 = vst [vmem:[%s3330_s25 + $0x20] sm:$0xff] %v1689_v12  ;;  %v1692_v13 = vadd.f32 %v1688_v32, %v1434_v20  ;;  %v1686_v15 = vmax.f32 %v1674_v44, 0.0 }
 0x61d   : > { %2020 = vst [vmem:[%s3330_s25 + $0x38] sm:$0xff] %v1692_v13  ;;  %v1690_v23 = vadd.f32 %v1686_v15, %v1432_v22 }
 0x61f   : > { %2018 = vst [vmem:[%s3330_s25 + $0x28] sm:$0xff] %v1690_v23 }
 0x620   : > { %2614 = shalt.err (!%p2611_p0)
}
 0x621   : > { %s2615_s15 = scalar_lea.hbm %s3352_s10, 1024  ;;  %s2619_s26 = scalar_lea.hbm %s3402_s5, 2048 }
 0x622   : > { %p2616_p1 = scmp.ne.s32.totalorder %s3352_s10, %s2615_s15  ;;  %p2620_p4 = scmp.lt.s32.totalorder %s3352_s10, %s3402_s5 }
 0x623   : > { %p2621_p7 = scmp.lt.s32.totalorder %s2619_s26, %s2615_s15 }
 0x624   : > { %p2617_p2 = pnand %p2616_p1, %p2746_p5 }
 0x625   : > { %p2622_p8 = por %p2621_p7, %p2620_p4 }
 0x626   : > { %p2618_p3 = pneg %p2617_p2 }
 0x628   : > { %p2623_p6 = pnand %p2622_p8, %p2618_p3 }
 0x62a   : > { %2626 = shalt.err (!%p2623_p6)
}
 0x62b   : > { %s2676_s25 = smov 128   ;;  %s2677_s6 = smov 8  }
 0x62c   : > { %2286 = dma.vmem_to_hbm [thread:$0]  (%p2746_p5), %s3346_s30, 1024, %s3352_s10, %s3357_s11, %s2676_s25, %s2676_s25, %s2677_s6  }
 0x62d PF: > { %p2298_p9 = scmp.ge.s32.totalorder %s2665_s21, 2  ;;  %s1728_s17 = sand.u32 1, %s2653_s18  }
 0x62e   : > { %p3414_p10 = scmp.ne.s32.totalorder %s3404_s29, 0  ;;  %s1729_s9 = scalar_lea.sflag [#allocation4], %s1728_s17 }
 0x630   : > { %p2293_p11 = pnand %p2298_p9, %p3414_p10 }
 0x632   : > { %p2294_p12 = pneg %p2293_p11 }
 0x634   : > { %2648 = dma.done.wait (%p2294_p12), %s1729_s9, 1024  }
 0x635   : > { %2650 = vsyncadd (%p2294_p12), %s1729_s9, 4294966272  ;;  %p16_p13 = scmp.ge.s32.totalorder %s2733_s24, 4   ;;  %s3415_s18 = smov %s2657_s19 }
 0x636   : > { %s3416_s19 = smov %s2661_s20  ;;  %s3417_s20 = smov %s2744_s27 }
 0x637   : > { %s3418_s21 = smov %s2733_s24  ;;  %18 = sbr.rel (!%p16_p13) target bundleno = 4 (0x4), region = 88 }
 0x63c   :  { %1734 = vsyncpa [#allocation3], 1 }
 0x63d   :  { %1736 = vsyncpa [#allocation3 + $0x1], 1 }
 0x63e   :  { %1737 = vsyncpa [#allocation4], 1 }
 0x63f   :  { %1739 = vsyncpa [#allocation4 + $0x1], 1 }

</bundles_post_ra>
